<compile_context>
chip_gen: v7x
topology: tpu7x:2x2x1
jax: 0.10.0
libtpu: 0.0.40
codegen_flags: <defaults>
</compile_context>

<pallas_src>
import math
import numpy as np

import jax
import jax.numpy as jnp
from jax.experimental import pallas as pl
from jax.experimental.pallas import tpu as pltpu


# ----------------------------------------------------------------------------
# Deterministic parameter / buffer construction (mirrors the PyTorch __init__)
# ----------------------------------------------------------------------------
def get_freq_indices(method):
    assert method in ['top1', 'top2', 'top4', 'top8', 'top16', 'top32',
                      'bot1', 'bot2', 'bot4', 'bot8', 'bot16', 'bot32',
                      'low1', 'low2', 'low4', 'low8', 'low16', 'low32']
    num_freq = int(method[3:])
    if 'top' in method:
        all_x = [0, 0, 6, 0, 0, 1, 1, 4, 5, 1, 3, 0, 0, 0, 3, 2, 4, 6, 3, 5, 5, 2, 6, 5, 5, 3, 3, 4, 2, 2, 6, 1]
        all_y = [0, 1, 0, 5, 2, 0, 2, 0, 0, 6, 0, 4, 6, 3, 5, 2, 6, 3, 3, 3, 5, 1, 1, 2, 4, 2, 1, 1, 3, 0, 5, 3]
    elif 'low' in method:
        all_x = [0, 0, 1, 1, 0, 2, 2, 1, 2, 0, 3, 4, 0, 1, 3, 0, 1, 2, 3, 4, 5, 0, 1, 2, 3, 4, 5, 6, 1, 2, 3, 4]
        all_y = [0, 1, 0, 1, 2, 0, 1, 2, 2, 3, 0, 0, 4, 3, 1, 5, 4, 3, 2, 1, 0, 6, 5, 4, 3, 2, 1, 0, 6, 5, 4, 3]
    else:  # bot
        all_x = [6, 1, 3, 3, 2, 4, 1, 2, 4, 4, 5, 1, 4, 6, 2, 5, 6, 1, 6, 2, 2, 4, 3, 3, 5, 5, 6, 2, 5, 5, 3, 6]
        all_y = [6, 4, 4, 6, 6, 3, 1, 4, 4, 5, 6, 5, 2, 2, 5, 1, 4, 3, 5, 0, 3, 1, 1, 2, 4, 2, 1, 1, 5, 3, 3, 3]
    return all_x[:num_freq], all_y[:num_freq]


def _build_filter(pos, freq, POS):
    result = math.cos(math.pi * freq * (pos + 0.5) / POS) / math.sqrt(POS)
    return result if freq == 0 else result * math.sqrt(2)


def build_dct_weights(in_channels, dct_h, dct_w, frequency_branches, frequency_selection):
    """Returns stacked DCT buffers, shape (num_freq, C, dct_h, dct_w), float32."""
    mapper_x, mapper_y = get_freq_indices(frequency_selection + str(frequency_branches))
    mapper_x = [mx * (dct_h // 7) for mx in mapper_x]
    mapper_y = [my * (dct_w // 7) for my in mapper_y]
    filters = np.zeros((frequency_branches, in_channels, dct_h, dct_w), dtype=np.float32)
    for f in range(frequency_branches):
        for tx in range(dct_h):
            for ty in range(dct_w):
                filters[f, :, tx, ty] = (_build_filter(tx, mapper_x[f], dct_h) *
                                         _build_filter(ty, mapper_y[f], dct_w))
    return jnp.asarray(filters)


# ----------------------------------------------------------------------------
# Shared in-kernel attention computation (per batch element)
# ----------------------------------------------------------------------------
def _attention_vector(xp, dct_ref, dct_sum_ref, w1_ref, w2_ref):
    """xp: (C, HWp) f32 pooled image -> (C, 1) f32 sigmoid attention vector."""
    num_freq, _, hwp = dct_ref.shape
    inv_f = 1.0 / num_freq

    # avg branch: one multiply + one lane reduction via the pre-summed DCT bank
    # (algebraically identical to summing per-frequency means).
    avg = jnp.sum(xp * dct_sum_ref[...], axis=-1, keepdims=True) * (inv_f / hwp)

    # max / min branches: stream over frequencies; only one (C, HWp) tile is
    # live at a time (no (F, C, HWp) temporary -> no spill traffic).
    # Note: lane reductions are over the logical HWp extent; Mosaic masks any
    # vreg lane padding when HWp is not a multiple of 128 (e.g. 7*7 = 49).
    mx = None
    mn = None
    for f in range(num_freq):                       # static unroll, F is small
        s = xp * dct_ref[f]
        m1 = jnp.max(s, axis=-1, keepdims=True)
        m2 = jnp.min(s, axis=-1, keepdims=True)
        mx = m1 if mx is None else mx + m1
        mn = m2 if mn is None else mn + m2
    mx = mx * inv_f
    mn = mn * inv_f

    # Shared FC stack applied to the three pooled features (columns of V).
    # Tiny matmuls -> latency only; executed exactly once per batch element.
    V = jnp.concatenate([avg, mx, mn], axis=1)                        # (C, 3)
    Hh = jnp.maximum(
        jnp.dot(w1_ref[...], V, preferred_element_type=jnp.float32), 0.0)  # (Cr, 3)
    M = jnp.dot(w2_ref[...], Hh, preferred_element_type=jnp.float32)       # (C, 3)
    return jax.nn.sigmoid(jnp.sum(M, axis=1, keepdims=True))          # (C, 1)


# ----------------------------------------------------------------------------
# Kernels
# ----------------------------------------------------------------------------
def mfca_kernel_identity(x_ref, dct_ref, dct_sum_ref, w1_ref, w2_ref, o_ref):
    """(H,W) == (dct_h,dct_w): x is the pooled source -> single read of x."""
    x = x_ref[0].astype(jnp.float32)                                  # (C, HW)
    attn = _attention_vector(x, dct_ref, dct_sum_ref, w1_ref, w2_ref)
    o_ref[0] = (x * attn).astype(o_ref.dtype)


def mfca_kernel_pooled(xp_ref, x_ref, dct_ref, dct_sum_ref, w1_ref, w2_ref,
                       o_ref, attn_ref):
    """Pooled path: attention phase at hw_tile==0, apply phase every tile."""
    @pl.when(pl.program_id(1) == 0)
    def _():
        xp = xp_ref[0].astype(jnp.float32)                            # (C, HWp)
        attn_ref[...] = _attention_vector(xp, dct_ref, dct_sum_ref,
                                          w1_ref, w2_ref)

    # Apply phase: lane-dense (1, C, T_HW) multiply + store.
    o_ref[0] = (x_ref[0].astype(jnp.float32) * attn_ref[...]).astype(o_ref.dtype)


# ----------------------------------------------------------------------------
# VMEM budgeting helpers (cap at 64 MiB so the tiling is v7x-safe)
# ----------------------------------------------------------------------------
def _padded_bytes(shape, dtype):
    shape = list(shape)
    if len(shape) >= 1:
        shape[-1] = -(-shape[-1] // 128) * 128
    if len(shape) >= 2:
        shape[-2] = -(-shape[-2] // 8) * 8
    n = 1
    for d in shape:
        n *= int(d)
    return n * jnp.dtype(dtype).itemsize


def _vmem_limit(block_shapes_dtypes, scratch_bytes=0):
    est = scratch_bytes
    for shp, dt in block_shapes_dtypes:
        est += 2 * _padded_bytes(shp, dt)    # pipeline double-buffers each block
    est += 1 << 20                           # margin for compiler scratch
    return int(min(64 * 2**20, max(est, 32 * 2**20)))


# ----------------------------------------------------------------------------
# Wrapper
# ----------------------------------------------------------------------------
def mfca_forward(x, dct_filters, w1, w2, dct_h, dct_w, *, hw_tile_lanes=2048):
    """x: (B, C, H, W) NCHW (f32 or bf16). Returns (B, C, H, W) in x.dtype."""
    B, C, H, W = x.shape
    F_ = dct_filters.shape[0]
    HWp = dct_h * dct_w
    HW = H * W
    c_red = w1.shape[0]

    dct = dct_filters.reshape(F_, C, HWp).astype(jnp.float32)
    dct_sum = jnp.sum(dct, axis=0)                                    # (C, HWp)
    w1 = w1.astype(jnp.float32)
    w2 = w2.astype(jnp.float32)

    if (H, W) == (dct_h, dct_w):
        # Identity pooling: read x from HBM exactly once per batch element.
        blocks = [((1, C, HW), x.dtype), ((F_, C, HWp), jnp.float32),
                  ((C, HWp), jnp.float32), ((c_red, C), jnp.float32),
                  ((C, c_red), jnp.float32), ((1, C, HW), x.dtype)]
        out = pl.pallas_call(
            mfca_kernel_identity,
            out_shape=jax.ShapeDtypeStruct((B, C, HW), x.dtype),
            grid_spec=pltpu.PrefetchScalarGridSpec(
                num_scalar_prefetch=0,
                grid=(B,),
                in_specs=[
                    pl.BlockSpec((1, C, HW), lambda b: (b, 0, 0)),
                    # Constant-index blocks below are DMA'd once (index never
                    # changes); they only cost one extra idle buffer each.
                    pl.BlockSpec((F_, C, HWp), lambda b: (0, 0, 0)),
                    pl.BlockSpec((C, HWp), lambda b: (0, 0)),
                    pl.BlockSpec((c_red, C), lambda b: (0, 0)),
                    pl.BlockSpec((C, c_red), lambda b: (0, 0)),
                ],
                out_specs=pl.BlockSpec((1, C, HW), lambda b: (b, 0, 0)),
            ),
            compiler_params=pltpu.CompilerParams(
                dimension_semantics=("parallel",),
                vmem_limit_bytes=_vmem_limit(blocks)),
        )(x.reshape(B, C, HW), dct, dct_sum, w1, w2)
        return out.reshape(B, C, H, W)

    # Pooled path: adaptive_avg_pool2d to (dct_h, dct_w) (exact when divisible).
    # TODO(synk): general (non-divisible) adaptive_avg_pool2d and fusing the
    # pooling into the kernel (saves one full HBM pass over x) not implemented.
    assert H % dct_h == 0 and W % dct_w == 0
    xp = x.reshape(B, C, dct_h, H // dct_h, dct_w, W // dct_w)
    xp = xp.astype(jnp.float32).mean(axis=(3, 5)).reshape(B, C, HWp)

    # HW tiling: large lane-dense tiles (multiple of 128) for pipeline depth and
    # unmasked stores; a trailing partial tile is handled by masked edge blocks.
    t_hw = HW if HW <= hw_tile_lanes else max((hw_tile_lanes // 128) * 128, 128)
    n_hw = pl.cdiv(HW, t_hw)

    blocks = [((1, C, HWp), jnp.float32), ((1, C, t_hw), x.dtype),
              ((F_, C, HWp), jnp.float32), ((C, HWp), jnp.float32),
              ((c_red, C), jnp.float32), ((C, c_red), jnp.float32),
              ((1, C, t_hw), x.dtype)]
    scratch_bytes = _padded_bytes((C, 1), jnp.float32)

    out = pl.pallas_call(
        mfca_kernel_pooled,
        out_shape=jax.ShapeDtypeStruct((B, C, HW), x.dtype),
        grid_spec=pltpu.PrefetchScalarGridSpec(
            num_scalar_prefetch=0,
            grid=(B, n_hw),
            in_specs=[
                pl.BlockSpec((1, C, HWp), lambda b, t: (b, 0, 0)),
                pl.BlockSpec((1, C, t_hw), lambda b, t: (b, 0, t)),
                pl.BlockSpec((F_, C, HWp), lambda b, t: (0, 0, 0)),
                pl.BlockSpec((C, HWp), lambda b, t: (0, 0)),
                pl.BlockSpec((c_red, C), lambda b, t: (0, 0)),
                pl.BlockSpec((C, c_red), lambda b, t: (0, 0)),
            ],
            out_specs=pl.BlockSpec((1, C, t_hw), lambda b, t: (b, 0, t)),
            scratch_shapes=[pltpu.VMEM((C, 1), jnp.float32)],
        ),
        # The HW axis must stay "arbitrary": tiles t > 0 reuse the attention
        # vector written to scratch at t == 0, so that axis cannot be sharded
        # across TensorCores.  Megacore parallelism comes from the batch axis.
        compiler_params=pltpu.CompilerParams(
            dimension_semantics=("parallel", "arbitrary"),
            vmem_limit_bytes=_vmem_limit(blocks, scratch_bytes)),
    )(xp, x.reshape(B, C, HW), dct, dct_sum, w1, w2)
    return out.reshape(B, C, H, W)


# ----------------------------------------------------------------------------
# Pure-JAX reference (mirrors the PyTorch forward) for a correctness check
# ----------------------------------------------------------------------------
def mfca_reference(x, dct_filters, w1, w2, dct_h, dct_w):
    B, C, H, W = x.shape
    xf = x.astype(jnp.float32)
    if (H, W) != (dct_h, dct_w):
        xp = xf.reshape(B, C, dct_h, H // dct_h, dct_w, W // dct_w).mean(axis=(3, 5))
    else:
        xp = xf
    F_ = dct_filters.shape[0]
    avg = jnp.zeros((B, C), jnp.float32)
    mx = jnp.zeros((B, C), jnp.float32)
    mn = jnp.zeros((B, C), jnp.float32)
    for f in range(F_):
        s = xp * dct_filters[f][None]
        avg = avg + s.mean(axis=(2, 3))
        mx = mx + s.max(axis=(2, 3))
        mn = mn + s.min(axis=(2, 3))
    avg, mx, mn = avg / F_, mx / F_, mn / F_

    def fc(v):  # v: (B, C)
        h = jnp.maximum(v @ w1.T, 0.0)
        return h @ w2.T

    attn = jax.nn.sigmoid(fc(avg) + fc(mx) + fc(mn))                  # (B, C)
    return (xf * attn[:, :, None, None]).astype(x.dtype)


# ----------------------------------------------------------------------------
if __name__ == "__main__":
    key = jax.random.PRNGKey(0)
    kx1, kx2, k1, k2 = jax.random.split(key, 4)

    C = 32
    dct_h = dct_w = 16
    frequency_branches = 16
    frequency_selection = 'top'
    reduction = 16
    c_red = max(C // reduction, 1)   # 2

    # 1x1 conv weights (no bias) -> plain matrices.
    w1 = jax.random.normal(k1, (c_red, C), dtype=jnp.float32) * 0.1
    w2 = jax.random.normal(k2, (C, c_red), dtype=jnp.float32) * 0.1
    dct_filters = build_dct_weights(C, dct_h, dct_w, frequency_branches, frequency_selection)

    # Case 1: identity pooling ((H,W) == (dct_h,dct_w)) -> single read of x.
    x1 = jax.random.normal(kx1, (2, C, 16, 16), dtype=jnp.float32)
    out1 = jax.block_until_ready(mfca_forward(x1, dct_filters, w1, w2, dct_h, dct_w))
    ref1 = jax.block_until_ready(mfca_reference(x1, dct_filters, w1, w2, dct_h, dct_w))
    if not np.allclose(np.asarray(out1), np.asarray(ref1), atol=1e-5, rtol=1e-5):
        raise AssertionError("Pallas MFCA kernel (identity-pooling path) does not match reference")

    # Case 2: adaptive-pooled path with HW tiling (grid = (B, HW // T_HW)).
    x2 = jax.random.normal(kx2, (2, C, 32, 32), dtype=jnp.float32)
    out2 = jax.block_until_ready(
        mfca_forward(x2, dct_filters, w1, w2, dct_h, dct_w, hw_tile_lanes=512))
    ref2 = jax.block_until_ready(mfca_reference(x2, dct_filters, w1, w2, dct_h, dct_w))
    if not np.allclose(np.asarray(out2), np.asarray(ref2), atol=1e-5, rtol=1e-5):
        raise AssertionError("Pallas MFCA kernel (pooled path) does not match reference")

    print("KERNEL_OK")
</pallas_src>

<mosaic_0001>
module attributes {stable_mosaic.version = 11 : i64} {
  func.func @mfca_kernel_identity(%arg0: i32, %arg1: memref<1x32x256xf32, #tpu.memory_space<vmem>>, %arg2: memref<16x32x256xf32, #tpu.memory_space<vmem>>, %arg3: memref<32x256xf32, #tpu.memory_space<vmem>>, %arg4: memref<2x32xf32, #tpu.memory_space<vmem>>, %arg5: memref<32x2xf32, #tpu.memory_space<vmem>>, %arg6: memref<1x32x256xf32, #tpu.memory_space<vmem>>) attributes {dimension_semantics = [#tpu.dimension_semantics<parallel>], iteration_bounds = array<i64: 2>, scalar_prefetch = 0 : i64, scratch_operands = 0 : i64, tpu.core_type = #tpu.core_type<tc>, window_params = [{transform_indices = @transform_0, window_bounds = array<i64: 1, 32, 256>}, {pipeline_mode = #tpu.pipeline_mode<synchronous>, transform_indices = @transform_1, window_bounds = array<i64: 16, 32, 256>}, {pipeline_mode = #tpu.pipeline_mode<synchronous>, transform_indices = @transform_2, window_bounds = array<i64: 32, 256>}, {pipeline_mode = #tpu.pipeline_mode<synchronous>, transform_indices = @transform_3, window_bounds = array<i64: 2, 32>}, {pipeline_mode = #tpu.pipeline_mode<synchronous>, transform_indices = @transform_4, window_bounds = array<i64: 32, 2>}, {transform_indices = @transform_5, window_bounds = array<i64: 1, 32, 256>}]} {
    %c0 = arith.constant 0 : index
    %c0_0 = arith.constant 0 : index
    %c0_1 = arith.constant 0 : index
    %0 = vector.load %arg1[%c0, %c0_0, %c0_1] : memref<1x32x256xf32, #tpu.memory_space<vmem>>, vector<1x32x256xf32>
    %1 = vector.shape_cast %0 : vector<1x32x256xf32> to vector<32x256xf32>
    %c0_2 = arith.constant 0 : index
    %c0_3 = arith.constant 0 : index
    %2 = vector.load %arg3[%c0_2, %c0_3] : memref<32x256xf32, #tpu.memory_space<vmem>>, vector<32x256xf32>
    %3 = arith.mulf %1, %2 : vector<32x256xf32>
    %cst = arith.constant dense<0.000000e+00> : vector<32xf32>
    %4 = vector.multi_reduction <add>, %3, %cst [1] : vector<32x256xf32> to vector<32xf32>
    %5 = vector.shape_cast %4 : vector<32xf32> to vector<32x1xf32>
    %cst_4 = arith.constant 2.44140625E-4 : f32
    %6 = vector.broadcast %cst_4 : f32 to vector<32x1xf32>
    %7 = arith.mulf %5, %6 : vector<32x1xf32>
    %c0_5 = arith.constant 0 : index
    %c0_6 = arith.constant 0 : index
    %c0_7 = arith.constant 0 : index
    %8 = vector.load %arg2[%c0_5, %c0_6, %c0_7] : memref<16x32x256xf32, #tpu.memory_space<vmem>>, vector<1x32x256xf32>
    %9 = vector.shape_cast %8 : vector<1x32x256xf32> to vector<32x256xf32>
    %10 = arith.mulf %1, %9 : vector<32x256xf32>
    %cst_8 = arith.constant dense<0xFF800000> : vector<32xf32>
    %11 = vector.multi_reduction <maximumf>, %10, %cst_8 [1] : vector<32x256xf32> to vector<32xf32>
    %12 = vector.shape_cast %11 : vector<32xf32> to vector<32x1xf32>
    %cst_9 = arith.constant dense<0x7F800000> : vector<32xf32>
    %13 = vector.multi_reduction <minimumf>, %10, %cst_9 [1] : vector<32x256xf32> to vector<32xf32>
    %14 = vector.shape_cast %13 : vector<32xf32> to vector<32x1xf32>
    %c1 = arith.constant 1 : index
    %c0_10 = arith.constant 0 : index
    %c0_11 = arith.constant 0 : index
    %15 = vector.load %arg2[%c1, %c0_10, %c0_11] : memref<16x32x256xf32, #tpu.memory_space<vmem>>, vector<1x32x256xf32>
    %16 = vector.shape_cast %15 : vector<1x32x256xf32> to vector<32x256xf32>
    %17 = arith.mulf %1, %16 : vector<32x256xf32>
    %cst_12 = arith.constant dense<0xFF800000> : vector<32xf32>
    %18 = vector.multi_reduction <maximumf>, %17, %cst_12 [1] : vector<32x256xf32> to vector<32xf32>
    %19 = vector.shape_cast %18 : vector<32xf32> to vector<32x1xf32>
    %cst_13 = arith.constant dense<0x7F800000> : vector<32xf32>
    %20 = vector.multi_reduction <minimumf>, %17, %cst_13 [1] : vector<32x256xf32> to vector<32xf32>
    %21 = vector.shape_cast %20 : vector<32xf32> to vector<32x1xf32>
    %22 = arith.addf %12, %19 : vector<32x1xf32>
    %23 = arith.addf %14, %21 : vector<32x1xf32>
    %c2 = arith.constant 2 : index
    %c0_14 = arith.constant 0 : index
    %c0_15 = arith.constant 0 : index
    %24 = vector.load %arg2[%c2, %c0_14, %c0_15] : memref<16x32x256xf32, #tpu.memory_space<vmem>>, vector<1x32x256xf32>
    %25 = vector.shape_cast %24 : vector<1x32x256xf32> to vector<32x256xf32>
    %26 = arith.mulf %1, %25 : vector<32x256xf32>
    %cst_16 = arith.constant dense<0xFF800000> : vector<32xf32>
    %27 = vector.multi_reduction <maximumf>, %26, %cst_16 [1] : vector<32x256xf32> to vector<32xf32>
    %28 = vector.shape_cast %27 : vector<32xf32> to vector<32x1xf32>
    %cst_17 = arith.constant dense<0x7F800000> : vector<32xf32>
    %29 = vector.multi_reduction <minimumf>, %26, %cst_17 [1] : vector<32x256xf32> to vector<32xf32>
    %30 = vector.shape_cast %29 : vector<32xf32> to vector<32x1xf32>
    %31 = arith.addf %22, %28 : vector<32x1xf32>
    %32 = arith.addf %23, %30 : vector<32x1xf32>
    %c3 = arith.constant 3 : index
    %c0_18 = arith.constant 0 : index
    %c0_19 = arith.constant 0 : index
    %33 = vector.load %arg2[%c3, %c0_18, %c0_19] : memref<16x32x256xf32, #tpu.memory_space<vmem>>, vector<1x32x256xf32>
    %34 = vector.shape_cast %33 : vector<1x32x256xf32> to vector<32x256xf32>
    %35 = arith.mulf %1, %34 : vector<32x256xf32>
    %cst_20 = arith.constant dense<0xFF800000> : vector<32xf32>
    %36 = vector.multi_reduction <maximumf>, %35, %cst_20 [1] : vector<32x256xf32> to vector<32xf32>
    %37 = vector.shape_cast %36 : vector<32xf32> to vector<32x1xf32>
    %cst_21 = arith.constant dense<0x7F800000> : vector<32xf32>
    %38 = vector.multi_reduction <minimumf>, %35, %cst_21 [1] : vector<32x256xf32> to vector<32xf32>
    %39 = vector.shape_cast %38 : vector<32xf32> to vector<32x1xf32>
    %40 = arith.addf %31, %37 : vector<32x1xf32>
    %41 = arith.addf %32, %39 : vector<32x1xf32>
    %c4 = arith.constant 4 : index
    %c0_22 = arith.constant 0 : index
    %c0_23 = arith.constant 0 : index
    %42 = vector.load %arg2[%c4, %c0_22, %c0_23] : memref<16x32x256xf32, #tpu.memory_space<vmem>>, vector<1x32x256xf32>
    %43 = vector.shape_cast %42 : vector<1x32x256xf32> to vector<32x256xf32>
    %44 = arith.mulf %1, %43 : vector<32x256xf32>
    %cst_24 = arith.constant dense<0xFF800000> : vector<32xf32>
    %45 = vector.multi_reduction <maximumf>, %44, %cst_24 [1] : vector<32x256xf32> to vector<32xf32>
    %46 = vector.shape_cast %45 : vector<32xf32> to vector<32x1xf32>
    %cst_25 = arith.constant dense<0x7F800000> : vector<32xf32>
    %47 = vector.multi_reduction <minimumf>, %44, %cst_25 [1] : vector<32x256xf32> to vector<32xf32>
    %48 = vector.shape_cast %47 : vector<32xf32> to vector<32x1xf32>
    %49 = arith.addf %40, %46 : vector<32x1xf32>
    %50 = arith.addf %41, %48 : vector<32x1xf32>
    %c5 = arith.constant 5 : index
    %c0_26 = arith.constant 0 : index
    %c0_27 = arith.constant 0 : index
    %51 = vector.load %arg2[%c5, %c0_26, %c0_27] : memref<16x32x256xf32, #tpu.memory_space<vmem>>, vector<1x32x256xf32>
    %52 = vector.shape_cast %51 : vector<1x32x256xf32> to vector<32x256xf32>
    %53 = arith.mulf %1, %52 : vector<32x256xf32>
    %cst_28 = arith.constant dense<0xFF800000> : vector<32xf32>
    %54 = vector.multi_reduction <maximumf>, %53, %cst_28 [1] : vector<32x256xf32> to vector<32xf32>
    %55 = vector.shape_cast %54 : vector<32xf32> to vector<32x1xf32>
    %cst_29 = arith.constant dense<0x7F800000> : vector<32xf32>
    %56 = vector.multi_reduction <minimumf>, %53, %cst_29 [1] : vector<32x256xf32> to vector<32xf32>
    %57 = vector.shape_cast %56 : vector<32xf32> to vector<32x1xf32>
    %58 = arith.addf %49, %55 : vector<32x1xf32>
    %59 = arith.addf %50, %57 : vector<32x1xf32>
    %c6 = arith.constant 6 : index
    %c0_30 = arith.constant 0 : index
    %c0_31 = arith.constant 0 : index
    %60 = vector.load %arg2[%c6, %c0_30, %c0_31] : memref<16x32x256xf32, #tpu.memory_space<vmem>>, vector<1x32x256xf32>
    %61 = vector.shape_cast %60 : vector<1x32x256xf32> to vector<32x256xf32>
    %62 = arith.mulf %1, %61 : vector<32x256xf32>
    %cst_32 = arith.constant dense<0xFF800000> : vector<32xf32>
    %63 = vector.multi_reduction <maximumf>, %62, %cst_32 [1] : vector<32x256xf32> to vector<32xf32>
    %64 = vector.shape_cast %63 : vector<32xf32> to vector<32x1xf32>
    %cst_33 = arith.constant dense<0x7F800000> : vector<32xf32>
    %65 = vector.multi_reduction <minimumf>, %62, %cst_33 [1] : vector<32x256xf32> to vector<32xf32>
    %66 = vector.shape_cast %65 : vector<32xf32> to vector<32x1xf32>
    %67 = arith.addf %58, %64 : vector<32x1xf32>
    %68 = arith.addf %59, %66 : vector<32x1xf32>
    %c7 = arith.constant 7 : index
    %c0_34 = arith.constant 0 : index
    %c0_35 = arith.constant 0 : index
    %69 = vector.load %arg2[%c7, %c0_34, %c0_35] : memref<16x32x256xf32, #tpu.memory_space<vmem>>, vector<1x32x256xf32>
    %70 = vector.shape_cast %69 : vector<1x32x256xf32> to vector<32x256xf32>
    %71 = arith.mulf %1, %70 : vector<32x256xf32>
    %cst_36 = arith.constant dense<0xFF800000> : vector<32xf32>
    %72 = vector.multi_reduction <maximumf>, %71, %cst_36 [1] : vector<32x256xf32> to vector<32xf32>
    %73 = vector.shape_cast %72 : vector<32xf32> to vector<32x1xf32>
    %cst_37 = arith.constant dense<0x7F800000> : vector<32xf32>
    %74 = vector.multi_reduction <minimumf>, %71, %cst_37 [1] : vector<32x256xf32> to vector<32xf32>
    %75 = vector.shape_cast %74 : vector<32xf32> to vector<32x1xf32>
    %76 = arith.addf %67, %73 : vector<32x1xf32>
    %77 = arith.addf %68, %75 : vector<32x1xf32>
    %c8 = arith.constant 8 : index
    %c0_38 = arith.constant 0 : index
    %c0_39 = arith.constant 0 : index
    %78 = vector.load %arg2[%c8, %c0_38, %c0_39] : memref<16x32x256xf32, #tpu.memory_space<vmem>>, vector<1x32x256xf32>
    %79 = vector.shape_cast %78 : vector<1x32x256xf32> to vector<32x256xf32>
    %80 = arith.mulf %1, %79 : vector<32x256xf32>
    %cst_40 = arith.constant dense<0xFF800000> : vector<32xf32>
    %81 = vector.multi_reduction <maximumf>, %80, %cst_40 [1] : vector<32x256xf32> to vector<32xf32>
    %82 = vector.shape_cast %81 : vector<32xf32> to vector<32x1xf32>
    %cst_41 = arith.constant dense<0x7F800000> : vector<32xf32>
    %83 = vector.multi_reduction <minimumf>, %80, %cst_41 [1] : vector<32x256xf32> to vector<32xf32>
    %84 = vector.shape_cast %83 : vector<32xf32> to vector<32x1xf32>
    %85 = arith.addf %76, %82 : vector<32x1xf32>
    %86 = arith.addf %77, %84 : vector<32x1xf32>
    %c9 = arith.constant 9 : index
    %c0_42 = arith.constant 0 : index
    %c0_43 = arith.constant 0 : index
    %87 = vector.load %arg2[%c9, %c0_42, %c0_43] : memref<16x32x256xf32, #tpu.memory_space<vmem>>, vector<1x32x256xf32>
    %88 = vector.shape_cast %87 : vector<1x32x256xf32> to vector<32x256xf32>
    %89 = arith.mulf %1, %88 : vector<32x256xf32>
    %cst_44 = arith.constant dense<0xFF800000> : vector<32xf32>
    %90 = vector.multi_reduction <maximumf>, %89, %cst_44 [1] : vector<32x256xf32> to vector<32xf32>
    %91 = vector.shape_cast %90 : vector<32xf32> to vector<32x1xf32>
    %cst_45 = arith.constant dense<0x7F800000> : vector<32xf32>
    %92 = vector.multi_reduction <minimumf>, %89, %cst_45 [1] : vector<32x256xf32> to vector<32xf32>
    %93 = vector.shape_cast %92 : vector<32xf32> to vector<32x1xf32>
    %94 = arith.addf %85, %91 : vector<32x1xf32>
    %95 = arith.addf %86, %93 : vector<32x1xf32>
    %c10 = arith.constant 10 : index
    %c0_46 = arith.constant 0 : index
    %c0_47 = arith.constant 0 : index
    %96 = vector.load %arg2[%c10, %c0_46, %c0_47] : memref<16x32x256xf32, #tpu.memory_space<vmem>>, vector<1x32x256xf32>
    %97 = vector.shape_cast %96 : vector<1x32x256xf32> to vector<32x256xf32>
    %98 = arith.mulf %1, %97 : vector<32x256xf32>
    %cst_48 = arith.constant dense<0xFF800000> : vector<32xf32>
    %99 = vector.multi_reduction <maximumf>, %98, %cst_48 [1] : vector<32x256xf32> to vector<32xf32>
    %100 = vector.shape_cast %99 : vector<32xf32> to vector<32x1xf32>
    %cst_49 = arith.constant dense<0x7F800000> : vector<32xf32>
    %101 = vector.multi_reduction <minimumf>, %98, %cst_49 [1] : vector<32x256xf32> to vector<32xf32>
    %102 = vector.shape_cast %101 : vector<32xf32> to vector<32x1xf32>
    %103 = arith.addf %94, %100 : vector<32x1xf32>
    %104 = arith.addf %95, %102 : vector<32x1xf32>
    %c11 = arith.constant 11 : index
    %c0_50 = arith.constant 0 : index
    %c0_51 = arith.constant 0 : index
    %105 = vector.load %arg2[%c11, %c0_50, %c0_51] : memref<16x32x256xf32, #tpu.memory_space<vmem>>, vector<1x32x256xf32>
    %106 = vector.shape_cast %105 : vector<1x32x256xf32> to vector<32x256xf32>
    %107 = arith.mulf %1, %106 : vector<32x256xf32>
    %cst_52 = arith.constant dense<0xFF800000> : vector<32xf32>
    %108 = vector.multi_reduction <maximumf>, %107, %cst_52 [1] : vector<32x256xf32> to vector<32xf32>
    %109 = vector.shape_cast %108 : vector<32xf32> to vector<32x1xf32>
    %cst_53 = arith.constant dense<0x7F800000> : vector<32xf32>
    %110 = vector.multi_reduction <minimumf>, %107, %cst_53 [1] : vector<32x256xf32> to vector<32xf32>
    %111 = vector.shape_cast %110 : vector<32xf32> to vector<32x1xf32>
    %112 = arith.addf %103, %109 : vector<32x1xf32>
    %113 = arith.addf %104, %111 : vector<32x1xf32>
    %c12 = arith.constant 12 : index
    %c0_54 = arith.constant 0 : index
    %c0_55 = arith.constant 0 : index
    %114 = vector.load %arg2[%c12, %c0_54, %c0_55] : memref<16x32x256xf32, #tpu.memory_space<vmem>>, vector<1x32x256xf32>
    %115 = vector.shape_cast %114 : vector<1x32x256xf32> to vector<32x256xf32>
    %116 = arith.mulf %1, %115 : vector<32x256xf32>
    %cst_56 = arith.constant dense<0xFF800000> : vector<32xf32>
    %117 = vector.multi_reduction <maximumf>, %116, %cst_56 [1] : vector<32x256xf32> to vector<32xf32>
    %118 = vector.shape_cast %117 : vector<32xf32> to vector<32x1xf32>
    %cst_57 = arith.constant dense<0x7F800000> : vector<32xf32>
    %119 = vector.multi_reduction <minimumf>, %116, %cst_57 [1] : vector<32x256xf32> to vector<32xf32>
    %120 = vector.shape_cast %119 : vector<32xf32> to vector<32x1xf32>
    %121 = arith.addf %112, %118 : vector<32x1xf32>
    %122 = arith.addf %113, %120 : vector<32x1xf32>
    %c13 = arith.constant 13 : index
    %c0_58 = arith.constant 0 : index
    %c0_59 = arith.constant 0 : index
    %123 = vector.load %arg2[%c13, %c0_58, %c0_59] : memref<16x32x256xf32, #tpu.memory_space<vmem>>, vector<1x32x256xf32>
    %124 = vector.shape_cast %123 : vector<1x32x256xf32> to vector<32x256xf32>
    %125 = arith.mulf %1, %124 : vector<32x256xf32>
    %cst_60 = arith.constant dense<0xFF800000> : vector<32xf32>
    %126 = vector.multi_reduction <maximumf>, %125, %cst_60 [1] : vector<32x256xf32> to vector<32xf32>
    %127 = vector.shape_cast %126 : vector<32xf32> to vector<32x1xf32>
    %cst_61 = arith.constant dense<0x7F800000> : vector<32xf32>
    %128 = vector.multi_reduction <minimumf>, %125, %cst_61 [1] : vector<32x256xf32> to vector<32xf32>
    %129 = vector.shape_cast %128 : vector<32xf32> to vector<32x1xf32>
    %130 = arith.addf %121, %127 : vector<32x1xf32>
    %131 = arith.addf %122, %129 : vector<32x1xf32>
    %c14 = arith.constant 14 : index
    %c0_62 = arith.constant 0 : index
    %c0_63 = arith.constant 0 : index
    %132 = vector.load %arg2[%c14, %c0_62, %c0_63] : memref<16x32x256xf32, #tpu.memory_space<vmem>>, vector<1x32x256xf32>
    %133 = vector.shape_cast %132 : vector<1x32x256xf32> to vector<32x256xf32>
    %134 = arith.mulf %1, %133 : vector<32x256xf32>
    %cst_64 = arith.constant dense<0xFF800000> : vector<32xf32>
    %135 = vector.multi_reduction <maximumf>, %134, %cst_64 [1] : vector<32x256xf32> to vector<32xf32>
    %136 = vector.shape_cast %135 : vector<32xf32> to vector<32x1xf32>
    %cst_65 = arith.constant dense<0x7F800000> : vector<32xf32>
    %137 = vector.multi_reduction <minimumf>, %134, %cst_65 [1] : vector<32x256xf32> to vector<32xf32>
    %138 = vector.shape_cast %137 : vector<32xf32> to vector<32x1xf32>
    %139 = arith.addf %130, %136 : vector<32x1xf32>
    %140 = arith.addf %131, %138 : vector<32x1xf32>
    %c15 = arith.constant 15 : index
    %c0_66 = arith.constant 0 : index
    %c0_67 = arith.constant 0 : index
    %141 = vector.load %arg2[%c15, %c0_66, %c0_67] : memref<16x32x256xf32, #tpu.memory_space<vmem>>, vector<1x32x256xf32>
    %142 = vector.shape_cast %141 : vector<1x32x256xf32> to vector<32x256xf32>
    %143 = arith.mulf %1, %142 : vector<32x256xf32>
    %cst_68 = arith.constant dense<0xFF800000> : vector<32xf32>
    %144 = vector.multi_reduction <maximumf>, %143, %cst_68 [1] : vector<32x256xf32> to vector<32xf32>
    %145 = vector.shape_cast %144 : vector<32xf32> to vector<32x1xf32>
    %cst_69 = arith.constant dense<0x7F800000> : vector<32xf32>
    %146 = vector.multi_reduction <minimumf>, %143, %cst_69 [1] : vector<32x256xf32> to vector<32xf32>
    %147 = vector.shape_cast %146 : vector<32xf32> to vector<32x1xf32>
    %148 = arith.addf %139, %145 : vector<32x1xf32>
    %149 = arith.addf %140, %147 : vector<32x1xf32>
    %cst_70 = arith.constant 6.250000e-02 : f32
    %150 = vector.broadcast %cst_70 : f32 to vector<32x1xf32>
    %151 = arith.mulf %148, %150 : vector<32x1xf32>
    %cst_71 = arith.constant 6.250000e-02 : f32
    %152 = vector.broadcast %cst_71 : f32 to vector<32x1xf32>
    %153 = arith.mulf %149, %152 : vector<32x1xf32>
    %154 = tpu.concatenate %7, %151, %153 in 1 : vector<32x1xf32>, vector<32x1xf32>, vector<32x1xf32> -> vector<32x3xf32>
    %c0_72 = arith.constant 0 : index
    %c0_73 = arith.constant 0 : index
    %155 = vector.load %arg4[%c0_72, %c0_73] : memref<2x32xf32, #tpu.memory_space<vmem>>, vector<2x32xf32>
    %cst_74 = arith.constant dense<0.000000e+00> : vector<2x3xf32>
    %156 = tpu.matmul %155, %154, %cst_74 {dimension_numbers = #tpu.dot_dimension_numbers<[1], [0], [0], [1], [0, 0, 1, 1], [], []>} : vector<2x32xf32>, vector<32x3xf32>, vector<2x3xf32> -> vector<2x3xf32>
    %cst_75 = arith.constant 0.000000e+00 : f32
    %157 = vector.broadcast %cst_75 : f32 to vector<2x3xf32>
    %158 = arith.maximumf %156, %157 : vector<2x3xf32>
    %c0_76 = arith.constant 0 : index
    %c0_77 = arith.constant 0 : index
    %159 = vector.load %arg5[%c0_76, %c0_77] : memref<32x2xf32, #tpu.memory_space<vmem>>, vector<32x2xf32>
    %cst_78 = arith.constant dense<0.000000e+00> : vector<32x3xf32>
    %160 = tpu.matmul %159, %158, %cst_78 {dimension_numbers = #tpu.dot_dimension_numbers<[1], [0], [0], [1], [0, 0, 1, 1], [], []>} : vector<32x2xf32>, vector<2x3xf32>, vector<32x3xf32> -> vector<32x3xf32>
    %cst_79 = arith.constant dense<0.000000e+00> : vector<32xf32>
    %161 = vector.multi_reduction <add>, %160, %cst_79 [1] : vector<32x3xf32> to vector<32xf32>
    %162 = vector.shape_cast %161 : vector<32xf32> to vector<32x1xf32>
    %163 = arith.negf %162 : vector<32x1xf32>
    %164 = math.exp %163 : vector<32x1xf32>
    %cst_80 = arith.constant 1.000000e+00 : f32
    %165 = vector.broadcast %cst_80 : f32 to vector<32x1xf32>
    %166 = arith.addf %165, %164 : vector<32x1xf32>
    %167 = arith.divf %165, %166 : vector<32x1xf32>
    %168 = vector.broadcast %167 : vector<32x1xf32> to vector<32x256xf32>
    %169 = arith.mulf %1, %168 : vector<32x256xf32>
    %c0_81 = arith.constant 0 : index
    %c0_82 = arith.constant 0 : index
    %c0_83 = arith.constant 0 : index
    %170 = vector.load %arg6[%c0_81, %c0_82, %c0_83] : memref<1x32x256xf32, #tpu.memory_space<vmem>>, vector<1x32x256xf32>
    %171 = vector.shape_cast %170 : vector<1x32x256xf32> to vector<32x256xf32>
    %172 = vector.shape_cast %169 : vector<32x256xf32> to vector<1x32x256xf32>
    tpu.vector_store %arg6[%c0_81, %c0_82, %c0_83], %172 {strides = array<i32>} : memref<1x32x256xf32, #tpu.memory_space<vmem>>, vector<1x32x256xf32>,
    return
  }
  func.func @transform_0(%arg0: i32) -> (i32, i32, i32) {
    %c0_i32 = arith.constant 0 : i32
    %c0_i32_0 = arith.constant 0 : i32
    %c0_i32_1 = arith.constant 0 : i32
    return %arg0, %c0_i32, %c0_i32_0 : i32, i32, i32
  }
  func.func @transform_1(%arg0: i32) -> (i32, i32, i32) {
    %c0_i32 = arith.constant 0 : i32
    %c0_i32_0 = arith.constant 0 : i32
    %c0_i32_1 = arith.constant 0 : i32
    %c0_i32_2 = arith.constant 0 : i32
    return %c0_i32, %c0_i32_0, %c0_i32_1 : i32, i32, i32
  }
  func.func @transform_2(%arg0: i32) -> (i32, i32) {
    %c0_i32 = arith.constant 0 : i32
    %c0_i32_0 = arith.constant 0 : i32
    %c0_i32_1 = arith.constant 0 : i32
    return %c0_i32, %c0_i32_0 : i32, i32
  }
  func.func @transform_3(%arg0: i32) -> (i32, i32) {
    %c0_i32 = arith.constant 0 : i32
    %c0_i32_0 = arith.constant 0 : i32
    %c0_i32_1 = arith.constant 0 : i32
    return %c0_i32, %c0_i32_0 : i32, i32
  }
  func.func @transform_4(%arg0: i32) -> (i32, i32) {
    %c0_i32 = arith.constant 0 : i32
    %c0_i32_0 = arith.constant 0 : i32
    %c0_i32_1 = arith.constant 0 : i32
    return %c0_i32, %c0_i32_0 : i32, i32
  }
  func.func @transform_5(%arg0: i32) -> (i32, i32, i32) {
    %c0_i32 = arith.constant 0 : i32
    %c0_i32_0 = arith.constant 0 : i32
    %c0_i32_1 = arith.constant 0 : i32
    return %arg0, %c0_i32, %c0_i32_0 : i32, i32, i32
  }
}

</mosaic_0001>

<bundles_post_ra>
// kernel: tpu_custom_call.1
= control target key start
LH: loop header
LB: loop body
LE: loop exit
PB: predicated region body
PF: predicated region fallthrough
CT: control target
= control target key end

     0   :  { %10 = vsyncpa [#allocation3], 0  ;;  %s2313_s0 = inlined_call_operand.hbm [shape: f32[2,32,256], index: 0, kind: input, shape index: {}]   ;;  %s2314_s1 = inlined_call_operand.hbm [shape: f32[16,32,256], index: 1, kind: input, shape index: {}]   ;;  %s2315_s2 = inlined_call_operand.hbm [shape: f32[32,256], index: 2, kind: input, shape index: {}]   ;;  %s2316_s3 = inlined_call_operand.vmem [shape: f32[2,32], index: 3, kind: input, shape index: {}]   ;;  %s2317_s4 = inlined_call_operand.vmem [shape: f32[32,2], index: 4, kind: input, shape index: {}]   ;;  %s2318_s5 = inlined_call_operand.hbm [shape: f32[2,32,256], index: 5, kind: output, shape index: {}]  }
   0x1   :  { %12 = vsyncpa [#allocation3 + $0x1], 0 }
   0x2   :  { %13 = vsyncpa [#allocation6], 0 }
   0x3   :  { %14 = vsyncpa [#allocation4], 0 }
   0x4   :  { %16 = vsyncpa [#allocation4 + $0x1], 0  ;;  %s1807_s18 = smov 0   ;;  %s1809_s19 = smov 0  }
   0x5   :  { %s1811_s20 = smov 0   ;;  %s1813_s21 = smov 0  }
   0x6 LB: > { %s1828_s22 = sadd.s32 4294967295, %s1764_s21   ;;  %s1445_s23 = sadd.s32 4294967294, %s1764_s21   ;;  %s1764_s21 = sphi %s1813_s21, %s2338_s21   ;;  %s1760_s20 = sphi %s1811_s20, %s2337_s20   ;;  %s1756_s19 = sphi %s1809_s19, %s2336_s19   ;;  %s1752_s18 = sphi %s1807_s18, %s2335_s18  }
   0x7   : > { %p42_p0 = scmp.ne.s32.totalorder %s1756_s19, %s1752_s18  ;;  %p2319_p1 = scmp.eq.s32.totalorder %s1828_s22, 0 }
   0x8   : > { %p156_p3 = scmp.eq.s32.totalorder %s1445_s23, 1  ;;  %p1446_p5 = scmp.ge.s32.totalorder %s1764_s21, 1 }
   0x9   : > { %p1837_p4 = por %p2319_p1, %p42_p0  ;;  %p163_p7 = scmp.lt.s32.totalorder %s1764_s21, 3 }
   0xa   : > { %p1842_p6 = por %p156_p3, %p42_p0  ;;  %s1766_s27 = smov [#allocation5]  }
   0xb   : > { %s2322_s24 = scalar_select %p1837_p4, 1, 0 }
   0xc   : > { %s2323_s25 = scalar_select %p1842_p6, 1, 0 }
   0xd   : > { %p1847_p8 = pnand %p1446_p5, %p163_p7  ;;  %s175_s28 = sshll.u32 %s1766_s27, 4  ;;  %s1851_s28 = int_to_ptr.vmem [resolvable:$true] %s175_s28 }
   0xe   : > { %s1767_s30 = smov [#allocation7]   ;;  %s1608_s9 = scalar_lea.hbm %s2314_s1, 16384 }
   0xf   : > { %p1522_p9 = pneg %p1847_p8  ;;  %s188_s6 = sshll.u32 %s1767_s30, 4  ;;  %s1862_s6 = int_to_ptr.vmem [resolvable:$true] %s188_s6 }
  0x10   : > { %p1609_p12 = scmp.ne.s32.totalorder %s2314_s1, %s1608_s9  ;;  %p1615_p5 = scmp.lt.u32.totalorder %s1608_s9, %s2314_s1 }
  0x11   : > { %p1858_p11 = pnand %p1522_p9, %p2319_p1 }
  0x13   : > { %p1610_p13 = pneg %p1858_p11 }
  0x15   : > { %p1611_p0 = pnand %p1610_p13, %p1609_p12 }
  0x17   : > { %p1612_p3 = pneg %p1611_p0 }
  0x19   : > { %p1617_p7 = pnand %p1615_p5, %p1612_p3 }
  0x1b   : > { %1620 = shalt.err (!%p1617_p7)
}
  0x1c   : > { %s1621_s14 = scalar_lea.vmem %s1851_s28, 16384  ;;  %p1629_p2 = scmp.lt.s32.totalorder %s1851_s28, %s1851_s28 }
  0x1d   : > { %p1622_p9 = scmp.ne.s32.totalorder %s1851_s28, %s1621_s14  ;;  %p1630_p12 = scmp.lt.s32.totalorder %s1621_s14, %s1621_s14 }
  0x1f   : > { %p1624_p10 = pnand %p1622_p9, %p1610_p13  ;;  %p1631_p0 = por %p1630_p12, %p1629_p2 }
  0x21   : > { %p1625_p1 = pneg %p1624_p10 }
  0x23   : > { %p1632_p6 = pnand %p1631_p0, %p1625_p1 }
  0x25   : > { %1635 = shalt.err (!%p1632_p6)
}
  0x26   : > { %s1768_s15 = smov 256   ;;  %s1769_s16 = smov 16  }
  0x27   : > { %1525 = dma.hbm_to_vmem [thread:$0]  (!%p1858_p11), %s2314_s1, 16384, %s1851_s28, [#allocation6], %s1768_s15, %s1768_s15, %s1769_s16  }
  0x28   : > { %s1636_s7 = scalar_lea.hbm %s2315_s2, 1024 }
  0x29   : > { %p1637_p1 = scmp.ne.s32.totalorder %s2315_s2, %s1636_s7  ;;  %p1643_p10 = scmp.lt.u32.totalorder %s1636_s7, %s2315_s2 }
  0x2b   : > { %p1639_p2 = pnand %p1637_p1, %p1610_p13 }
  0x2d   : > { %p1640_p6 = pneg %p1639_p2 }
  0x2f   : > { %p1645_p3 = pnand %p1643_p10, %p1640_p6 }
  0x31   : > { %1648 = shalt.err (!%p1645_p3)
}
  0x32   : > { %s1649_s28 = scalar_lea.vmem %s1862_s6, 1024  ;;  %p1657_p12 = scmp.lt.s32.totalorder %s1862_s6, %s1862_s6 }
  0x33   : > { %p1650_p5 = scmp.ne.s32.totalorder %s1862_s6, %s1649_s28  ;;  %p1658_p0 = scmp.lt.s32.totalorder %s1649_s28, %s1649_s28 }
  0x35   : > { %p1652_p7 = pnand %p1650_p5, %p1610_p13  ;;  %p1659_p1 = por %p1658_p0, %p1657_p12 }
  0x37   : > { %p1653_p9 = pneg %p1652_p7 }
  0x39   : > { %p1660_p2 = pnand %p1659_p1, %p1653_p9 }
  0x3b   : > { %1663 = shalt.err (!%p1660_p2)
}
  0x3c   : > { %1528 = dma.hbm_to_vmem [thread:$0]  (!%p1858_p11), %s2315_s2, 1024, %s1862_s6, [#allocation6], %s1768_s15, %s1768_s15, %s1769_s16  }
  0x3d   : > { %s1923_s29 = sadd.s32 1, %s1764_s21   ;;  %s29_s14 = sadd.s32 1, %s1760_s20 }
  0x3e   : > { %s26_s17 = ssub.s32 %s1764_s21, %s1923_s29  ;;  %p36_p13 = scmp.ne.s32.totalorder %s1760_s20, %s1756_s19 }
  0x3f   : > { %p27_p6 = scmp.eq.s32.totalorder %s26_s17, 0  ;;  %p37_p10 = scmp.eq.s32.totalorder %s1764_s21, 0 }
  0x40   : > { %p2326_p3 = scmp.eq.s32.totalorder %s1828_s22, 1  ;;  %p1539_p7 = scmp.lt.s32.totalorder %s1764_s21, 2 }
  0x41   : > { %s1939_s27 = scalar_select %p27_p6, %s1760_s20, %s29_s14  }
  0x42   : > { %p1933_p5 = por %p2326_p3, %p36_p13  ;;  %p38_p9 = por %p37_p10, %p36_p13 }
  0x43   : > { %s208_s30 = sand.u32 1, %s1760_s20   ;;  %s1473_s6 = sshll.u32 %s1764_s21, 10 }
  0x44   : > { %s2327_s23 = scalar_select %p1933_p5, 1, 0 }
  0x45   : > { %s1450_s7 = sshll.u32 %s208_s30, 6  ;;  %s1946_s10 = scalar_lea.hbm %s2313_s0, %s1473_s6 }
  0x46   : > { %s212_s11 = scalar_lea.vmem [#allocation2], %s1450_s7  ;;  %p1950_p11 = pnand %p1539_p7, %p38_p9 }
  0x47   : > { %s219_s28 = sshll.u32 %s212_s11, 4  ;;  %s1954_s13 = scalar_lea.sflag [#allocation3], %s208_s30  ;;  %s1948_s28 = int_to_ptr.vmem [resolvable:$true] %s219_s28 }
  0x48   : > { %s1664_s14 = scalar_lea.hbm %s1946_s10, 1024  ;;  %p1666_p0 = pneg %p1950_p11 }
  0x49   : > { %p1665_p12 = scmp.ne.s32.totalorder %s1946_s10, %s1664_s14  ;;  %s1669_s6 = scalar_lea.hbm %s2313_s0, 2048 }
  0x4a   : > { %p1670_p13 = scmp.lt.u32.totalorder %s1946_s10, %s2313_s0  ;;  %p1671_p6 = scmp.lt.u32.totalorder %s1669_s6, %s1664_s14 }
  0x4b   : > { %p1667_p1 = pnand %p1666_p0, %p1665_p12  ;;  %p1673_p3 = scmp.lt.u32.totalorder %s1664_s14, %s1946_s10 }
  0x4c   : > { %p1672_p10 = por %p1671_p6, %p1670_p13 }
  0x4d   : > { %p1668_p2 = pneg %p1667_p1 }
  0x4e   : > { %p1674_p7 = por %p1673_p3, %p1672_p10 }
  0x50   : > { %p1675_p9 = pnand %p1674_p7, %p1668_p2 }
  0x52   : > { %1678 = shalt.err (!%p1675_p9)
}
  0x53   : > { %s1679_s30 = scalar_lea.vmem %s1948_s28, 1024  ;;  %s1770_s11 = smov [#allocation2]  }
  0x54   : > { %p1680_p12 = scmp.ne.s32.totalorder %s1948_s28, %s1679_s30  ;;  %s1684_s17 = sshll.u32 %s1770_s11, 4  ;;  %s1685_s17 = int_to_ptr.vmem [resolvable:$false] %s1684_s17 }
  0x55   : > { %s1686_s7 = scalar_lea.vmem %s1685_s17, 2048  ;;  %p1687_p4 = scmp.lt.s32.totalorder %s1948_s28, %s1685_s17 }
  0x56   : > { %p1682_p1 = pnand %p1680_p12, %p1666_p0  ;;  %p1688_p13 = scmp.lt.s32.totalorder %s1686_s7, %s1679_s30 }
  0x58   : > { %p1683_p5 = pneg %p1682_p1  ;;  %p1689_p6 = por %p1688_p13, %p1687_p4 }
  0x5a   : > { %p1690_p10 = pnand %p1689_p6, %p1683_p5 }
  0x5c   : > { %1693 = shalt.err (!%p1690_p10)
}
  0x5d   : > { %1532 = dma.hbm_to_vmem [thread:$0]  (!%p1950_p11), %s1946_s10, 1024, %s1948_s28, %s1954_s13, %s1768_s15, %s1768_s15, %s1769_s16  }
  0x5e   : > { %231 = sbr.rel (%p1847_p8) target bundleno = 1142 (0x476), region = 40  ;;  %s1988_s14 = sand.u32 (!%p1847_p8), 1, %s1756_s19  }
  0x5f   : > { %s1454_s6 = sshll.u32 (!%p1847_p8), %s1988_s14, 6  ;;  %s234_s8 = scalar_lea.sflag (!%p1847_p8), [#allocation3], %s1988_s14 }
  0x60   : > { %s1994_s12 = scalar_lea.vmem (!%p1847_p8), [#allocation2], %s1454_s6  ;;  %p2329_p4 = scmp.ne.s32.totalorder (!%p1847_p8), %s2322_s24, 0 }
  0x65   : > { %1739 = dma.done.wait (%p2329_p4), %s234_s8, 1024  }
  0x66   : > { %1741 = vsyncadd (%p2329_p4), %s234_s8, 4294966272  ;;  %p2330_p5 = scmp.eq.s32.totalorder %s1828_s22, 0 }
  0x68   : > { %1743 = dma.done.wait (%p2330_p5), [#allocation6], 17408   ;;  %p2331_p8 = pmov %p2330_p5 }
  0x69   : > { %v2005_v0 = vld [vmem:[%s1994_s12] sm:$0xff]  ;;  %v2008_v1 = vld [vmem:[%s1994_s12 + $0x8] sm:$0xff]  ;;  %v2015_v10 = vld [vmem:[%s1994_s12 + $0x10] sm:$0xff]  ;;  %vm1772_vm0 = vmmov 0   ;;  %vm1095_vm1 = vcmask 7168   ;;  %vm1100_vm2 = vcmask 15360  }
  0x6a   : > { %1745 = vsyncadd (%p2331_p8), [#allocation6], 4294949888  ;;  %v353_v2 = vld [vmem:[#allocation5 + $0x40] sm:$0xff]  ;;  %v354_v3 = vld [vmem:[#allocation5 + $0x48] sm:$0xff]  ;;  %vm1106_vm3 = vcmask 261120   ;;  %vm1197_vm4 = vcmask 1041408  }
  0x6b   : > { %v361_v4 = vmul.f32 %v353_v2, %v2005_v0  ;;  %v312_v5 = vld [vmem:[#allocation5] sm:$0xff]  ;;  %v313_v6 = vld [vmem:[#allocation5 + $0x8] sm:$0xff]  ;;  %v362_v7 = vmul.f32 %v354_v3, %v2008_v1  ;;  %v2018_v11 = vld [vmem:[%s1994_s12 + $0x18] sm:$0xff]  ;;  %vm1286_vm5 = vcmask 23552   ;;  %s1474_s17 = sshll.u32 %s1828_s22, 10  ;;  %s271_s7 = scalar_lea.vmem [#allocation8], %s1454_s6 }
  0x6c   : > { %v320_v8 = vmul.f32 %v312_v5, %v2005_v0  ;;  %v321_v9 = vmul.f32 %v313_v6, %v2008_v1  ;;  %v355_v12 = vld [vmem:[#allocation5 + $0x50] sm:$0xff]  ;;  %v356_v13 = vld [vmem:[#allocation5 + $0x58] sm:$0xff]  ;;  %v402_v28 = vld [vmem:[#allocation5 + $0x80] sm:$0xff]  ;;  %s1353_s8 = sshll.u32 %s271_s7, 4  ;;  %s2265_s26 = scalar_lea.hbm %s2318_s5, %s1474_s17  ;;  %s2267_s8 = int_to_ptr.vmem [resolvable:$true] %s1353_s8 }
  0x6d   : > { %v363_v14 = vmul.f32 %v355_v12, %v2015_v10  ;;  %v314_v15 = vld [vmem:[#allocation5 + $0x10] sm:$0xff]  ;;  %v315_v16 = vld [vmem:[#allocation5 + $0x18] sm:$0xff]  ;;  %v369_v17 = vmax.f32 %v361_v4, %v362_v7  ;;  %v364_v19 = vmul.f32 %v356_v13, %v2018_v11  ;;  %v403_v29 = vld [vmem:[#allocation5 + $0x88] sm:$0xff]  ;;  %v381_v31 = vmin.f32 %v361_v4, %v362_v7  ;;  %s1340_s22 = scalar_lea.sflag [#allocation4], %s1988_s14  ;;  %s1694_s6 = scalar_lea.vmem %s2267_s8, 1024 }
  0x6e   : > { %v328_v18 = vmax.f32 %v320_v8, %v321_v9  ;;  %v322_v20 = vmul.f32 %v314_v15, %v2015_v10  ;;  %v323_v21 = vmul.f32 %v315_v16, %v2018_v11  ;;  %v340_v25 = vmin.f32 %v320_v8, %v321_v9  ;;  %v404_v26 = vld [vmem:[#allocation5 + $0x90] sm:$0xff]  ;;  %v405_v27 = vld [vmem:[#allocation5 + $0x98] sm:$0xff]  ;;  %v2035_v42 = vld [vmem:[%s1994_s12 + $0x20] sm:$0xff]  ;;  %p1695_p11 = scmp.ne.s32.totalorder %s2267_s8, %s1694_s6  ;;  %p2332_p0 = scmp.ne.s32.totalorder %s2327_s23, 0 }
  0x6f   : > { %370 = vmax.xlane.f32.xlu1 %v369_v17  ;;  %v372_v22 = vmax.f32 %v363_v14, %v364_v19  ;;  %v384_v30 = vmin.f32 %v363_v14, %v364_v19  ;;  %v412_v32 = vmul.f32 %v404_v26, %v2015_v10  ;;  %v413_v33 = vmul.f32 %v405_v27, %v2018_v11  ;;  %v2029_v36 = vld [vmem:[%s1994_s12 + $0x30] sm:$0xff]  ;;  %v2032_v37 = vld [vmem:[%s1994_s12 + $0x38] sm:$0xff]  ;;  %v2038_v43 = vld [vmem:[%s1994_s12 + $0x28] sm:$0xff]  ;;  %s1774_s15 = smov [#allocation8]  }
  0x70   : > { %329 = vmax.xlane.f32.xlu0 %v328_v18  ;;  %v331_v23 = vmax.f32 %v322_v20, %v323_v21  ;;  %v343_v24 = vmin.f32 %v322_v20, %v323_v21  ;;  %v410_v34 = vmul.f32 %v402_v28, %v2005_v0  ;;  %v411_v35 = vmul.f32 %v403_v29, %v2008_v1  ;;  %v318_v40 = vld [vmem:[#allocation5 + $0x30] sm:$0xff]  ;;  %v319_v41 = vld [vmem:[#allocation5 + $0x38] sm:$0xff]  ;;  %v316_v44 = vld [vmem:[#allocation5 + $0x20] sm:$0xff]  ;;  %p1696_p2 = pnand %p1695_p11, %p2332_p0  ;;  %s1698_s16 = sshll.u32 %s1774_s15, 4  ;;  %s1699_s16 = int_to_ptr.vmem [resolvable:$false] %s1698_s16 }
  0x71   : > { %v421_v38 = vmax.f32 %v412_v32, %v413_v33  ;;  %v317_v45 = vld [vmem:[#allocation5 + $0x28] sm:$0xff]  ;;  %v433_v46 = vmin.f32 %v412_v32, %v413_v33  ;;  %v326_v47 = vmul.f32 %v318_v40, %v2029_v36  ;;  %v327_v48 = vmul.f32 %v319_v41, %v2032_v37  ;;  %v359_v52 = vld [vmem:[#allocation5 + $0x70] sm:$0xff]  ;;  %v360_v53 = vld [vmem:[#allocation5 + $0x78] sm:$0xff]  ;;  %s1700_s10 = scalar_lea.vmem %s1699_s16, 2048  ;;  %p1701_p7 = scmp.lt.s32.totalorder %s2267_s8, %s1699_s16 }
  0x72   : > { %v418_v39 = vmax.f32 %v410_v34, %v411_v35  ;;  %v430_v49 = vmin.f32 %v410_v34, %v411_v35  ;;  %v324_v50 = vmul.f32 %v316_v44, %v2035_v42  ;;  %v325_v51 = vmul.f32 %v317_v45, %v2038_v43  ;;  %v357_v54 = vld [vmem:[#allocation5 + $0x60] sm:$0xff]  ;;  %v358_v55 = vld [vmem:[#allocation5 + $0x68] sm:$0xff]  ;;  %v453_v62 = vld [vmem:[#allocation5 + $0xd0] sm:$0xff]  ;;  %p1697_p3 = pneg %p1696_p2  ;;  %p1702_p9 = scmp.lt.s32.totalorder %s1700_s10, %s1694_s6 }
  0x73   : > { %373 = vmax.xlane.f32.xlu1 %v372_v22  ;;  %v337_v56 = vmax.f32 %v326_v47, %v327_v48  ;;  %v367_v57 = vmul.f32 %v359_v52, %v2029_v36  ;;  %v368_v58 = vmul.f32 %v360_v53, %v2032_v37  ;;  %v365_v60 = vmul.f32 %v357_v54, %v2035_v42  ;;  %v454_v63 = vld [vmem:[#allocation5 + $0xd8] sm:$0xff]  ;;  %v451_v2 = vld [vmem:[#allocation5 + $0xc0] sm:$0xff]  ;;  %v452_v3 = vld [vmem:[#allocation5 + $0xc8] sm:$0xff] }
  0x74   : > { %332 = vmax.xlane.f32.xlu0 %v331_v23  ;;  %v334_v59 = vmax.f32 %v324_v50, %v325_v51  ;;  %v366_v61 = vmul.f32 %v358_v55, %v2038_v43  ;;  %v461_v5 = vmul.f32 %v453_v62, %v2015_v10  ;;  %v462_v6 = vmul.f32 %v454_v63, %v2018_v11  ;;  %v408_v18 = vld [vmem:[#allocation5 + $0xb0] sm:$0xff]  ;;  %v409_v19 = vld [vmem:[#allocation5 + $0xb8] sm:$0xff]  ;;  %v406_v20 = vld [vmem:[#allocation5 + $0xa0] sm:$0xff]  ;;  %p1703_p12 = por %p1702_p9, %p1701_p7 }
  0x75   : > { %v378_v4 = vmax.f32 %v367_v57, %v368_v58  ;;  %v459_v8 = vmul.f32 %v451_v2, %v2005_v0  ;;  %v460_v9 = vmul.f32 %v452_v3, %v2008_v1  ;;  %v349_v14 = vmin.f32 %v326_v47, %v327_v48  ;;  %v407_v21 = vld [vmem:[#allocation5 + $0xa8] sm:$0xff]  ;;  %v502_v28 = vld [vmem:[#allocation5 + $0x110] sm:$0xff]  ;;  %v503_v29 = vld [vmem:[#allocation5 + $0x118] sm:$0xff] }
  0x76   : > { %v375_v7 = vmax.f32 %v365_v60, %v366_v61  ;;  %v470_v12 = vmax.f32 %v461_v5, %v462_v6  ;;  %v346_v15 = vmin.f32 %v324_v50, %v325_v51  ;;  %v390_v16 = vmin.f32 %v367_v57, %v368_v58  ;;  %v458_v47 = vld [vmem:[#allocation5 + $0xf8] sm:$0xff]  ;;  %v455_v48 = vld [vmem:[#allocation5 + $0xe0] sm:$0xff]  ;;  %p1704_p1 = pnand %p1703_p12, %p1697_p3 }
  0x77   : > { %344 = vmin.xlane.f32.xlu1 %v343_v24  ;;  %v467_v13 = vmax.f32 %v459_v8, %v460_v9  ;;  %v387_v17 = vmin.f32 %v365_v60, %v366_v61  ;;  %v482_v22 = vmin.f32 %v461_v5, %v462_v6  ;;  %v416_v23 = vmul.f32 %v408_v18, %v2029_v36  ;;  %v552_v57 = vld [vmem:[#allocation5 + $0x158] sm:$0xff]  ;;  %v549_v58 = vld [vmem:[#allocation5 + $0x140] sm:$0xff] }
  0x78   : > { %341 = vmin.xlane.f32.xlu0 %v340_v25  ;;  %v417_v24 = vmul.f32 %v409_v19, %v2032_v37  ;;  %v479_v25 = vmin.f32 %v459_v8, %v460_v9  ;;  %v414_v26 = vmul.f32 %v406_v20, %v2035_v42  ;;  %v415_v27 = vmul.f32 %v407_v21, %v2038_v43  ;;  %v506_v8 = vld [vmem:[#allocation5 + $0x130] sm:$0xff]  ;;  %v507_v9 = vld [vmem:[#allocation5 + $0x138] sm:$0xff] }
  0x79   : > { %v510_v33 = vmul.f32 %v502_v28, %v2015_v10  ;;  %v511_v34 = vmul.f32 %v503_v29, %v2018_v11  ;;  %v466_v53 = vmul.f32 %v458_v47, %v2032_v37  ;;  %v463_v54 = vmul.f32 %v455_v48, %v2035_v42  ;;  %v600_v20 = vld [vmem:[#allocation5 + $0x190] sm:$0xff]  ;;  %v601_v21 = vld [vmem:[#allocation5 + $0x198] sm:$0xff] }
  0x7a   : > { %v427_v32 = vmax.f32 %v416_v23, %v417_v24  ;;  %v424_v35 = vmax.f32 %v414_v26, %v415_v27  ;;  %v439_v44 = vmin.f32 %v416_v23, %v417_v24  ;;  %v436_v45 = vmin.f32 %v414_v26, %v415_v27  ;;  %v599_v23 = vld [vmem:[#allocation5 + $0x188] sm:$0xff]  ;;  %v649_v48 = vld [vmem:[#allocation5 + $0x1d0] sm:$0xff] }
  0x7b   : > { %385 = vmin.xlane.f32.xlu1 %v384_v30  ;;  %v500_v30 = vld [vmem:[#allocation5 + $0x100] sm:$0xff]  ;;  %v519_v40 = vmax.f32 %v510_v33, %v511_v34  ;;  %v531_v50 = vmin.f32 %v510_v33, %v511_v34  ;;  %v560_v61 = vmul.f32 %v552_v57, %v2018_v11  ;;  %v557_v62 = vmul.f32 %v549_v58, %v2005_v0  ;;  %v555_v34 = vld [vmem:[#allocation5 + $0x170] sm:$0xff] }
  0x7c   : > { %382 = vmin.xlane.f32.xlu0 %v381_v31  ;;  %v501_v31 = vld [vmem:[#allocation5 + $0x108] sm:$0xff]  ;;  %v608_v24 = vmul.f32 %v600_v20, %v2015_v10  ;;  %v607_v29 = vmul.f32 %v599_v23, %v2008_v1 }
  0x7f   : > { %422 = vmax.xlane.f32.xlu1 %v421_v38  ;;  %v508_v38 = vmul.f32 %v500_v30, %v2005_v0 }
  0x80   : > { %419 = vmax.xlane.f32.xlu0 %v418_v39  ;;  %v509_v39 = vmul.f32 %v501_v31, %v2008_v1 }
  0x82   : > { %v516_v41 = vmax.f32 %v508_v38, %v509_v39  ;;  %v528_v51 = vmin.f32 %v508_v38, %v509_v39  ;;  %v553_v38 = vld [vmem:[#allocation5 + $0x160] sm:$0xff]  ;;  %v554_v39 = vld [vmem:[#allocation5 + $0x168] sm:$0xff] }
  0x83   : > { %434 = vmin.xlane.f32.xlu1 %v433_v46  ;;  %v457_v46 = vld [vmem:[#allocation5 + $0xf0] sm:$0xff]  ;;  %v562_v47 = vmul.f32 %v554_v39, %v2038_v43  ;;  %v748_v39 = vld [vmem:[#allocation5 + $0x258] sm:$0xff] }
  0x84   : > { %431 = vmin.xlane.f32.xlu0 %v430_v49  ;;  %v456_v49 = vld [vmem:[#allocation5 + $0xe8] sm:$0xff]  ;;  %v465_v52 = vmul.f32 %v457_v46, %v2029_v36  ;;  %v561_v46 = vmul.f32 %v553_v38, %v2035_v42  ;;  %v747_v38 = vld [vmem:[#allocation5 + $0x250] sm:$0xff] }
  0x85   : > { %v464_v55 = vmul.f32 %v456_v49, %v2038_v43  ;;  %v650_v49 = vld [vmem:[#allocation5 + $0x1d8] sm:$0xff] }
  0x86   : > { %v476_v63 = vmax.f32 %v465_v52, %v466_v53  ;;  %v488_v6 = vmin.f32 %v465_v52, %v466_v53  ;;  %v657_v52 = vmul.f32 %v649_v48, %v2015_v10  ;;  %v658_v53 = vmul.f32 %v650_v49, %v2018_v11 }
  0x87   : > { %338 = vmax.xlane.f32.xlu1 %v337_v56  ;;  %v551_v56 = vld [vmem:[#allocation5 + $0x150] sm:$0xff]  ;;  %v473_v2 = vmax.f32 %v463_v54, %v464_v55 }
  0x88   : > { %335 = vmax.xlane.f32.xlu0 %v334_v59  ;;  %v550_v59 = vld [vmem:[#allocation5 + $0x148] sm:$0xff]  ;;  %v559_v60 = vmul.f32 %v551_v56, %v2015_v10  ;;  %v571_v56 = vmax.f32 %v561_v46, %v562_v47  ;;  %v666_v58 = vmax.f32 %v657_v52, %v658_v53 }
  0x89   : > { %v558_v3 = vmul.f32 %v550_v59, %v2008_v1 }
  0x8b   : > { %379 = vmax.xlane.f32.xlu1 %v378_v4  ;;  %v568_v4 = vmax.f32 %v559_v60, %v560_v61  ;;  %v565_v5 = vmax.f32 %v557_v62, %v558_v3 }
  0x8c   : > { %376 = vmax.xlane.f32.xlu0 %v375_v7  ;;  %v485_v7 = vmin.f32 %v463_v54, %v464_v55 }
  0x8f   : > { %471 = vmax.xlane.f32.xlu1 %v470_v12  ;;  %v504_v12 = vld [vmem:[#allocation5 + $0x120] sm:$0xff] }
  0x90   : > { %468 = vmax.xlane.f32.xlu0 %v467_v13  ;;  %v505_v13 = vld [vmem:[#allocation5 + $0x128] sm:$0xff]  ;;  %v512_v18 = vmul.f32 %v504_v12, %v2035_v42  ;;  %v698_v12 = vld [vmem:[#allocation5 + $0x210] sm:$0xff] }
  0x91   : > { %v513_v19 = vmul.f32 %v505_v13, %v2038_v43  ;;  %v699_v13 = vld [vmem:[#allocation5 + $0x218] sm:$0xff] }
  0x93   : > { %350 = vmin.xlane.f32.xlu1 %v349_v14  ;;  %v580_v14 = vmin.f32 %v559_v60, %v560_v61  ;;  %v522_v28 = vmax.f32 %v512_v18, %v513_v19  ;;  %v534_v33 = vmin.f32 %v512_v18, %v513_v19  ;;  %v583_v61 = vmin.f32 %v561_v46, %v562_v47 }
  0x94   : > { %347 = vmin.xlane.f32.xlu0 %v346_v15  ;;  %v577_v15 = vmin.f32 %v557_v62, %v558_v3  ;;  %v604_v62 = vld [vmem:[#allocation5 + $0x1b0] sm:$0xff]  ;;  %v603_v3 = vld [vmem:[#allocation5 + $0x1a8] sm:$0xff]  ;;  %v707_v18 = vmul.f32 %v699_v13, %v2018_v11 }
  0x97   : > { %391 = vmin.xlane.f32.xlu1 %v390_v16  ;;  %v514_v16 = vmul.f32 %v506_v8, %v2029_v36 }
  0x98   : > { %388 = vmin.xlane.f32.xlu0 %v387_v17  ;;  %v515_v17 = vmul.f32 %v507_v9, %v2032_v37  ;;  %v611_v9 = vmul.f32 %v603_v3, %v2038_v43  ;;  %v797_v3 = vld [vmem:[#allocation5 + $0x298] sm:$0xff] }
  0x9a   : > { %v525_v27 = vmax.f32 %v514_v16, %v515_v17 }
  0x9b   : > { %483 = vmin.xlane.f32.xlu1 %v482_v22  ;;  %v598_v22 = vld [vmem:[#allocation5 + $0x180] sm:$0xff] }
  0x9c   : > { %480 = vmin.xlane.f32.xlu0 %v479_v25  ;;  %v609_v25 = vmul.f32 %v601_v21, %v2018_v11  ;;  %v606_v26 = vmul.f32 %v598_v22, %v2005_v0 }
  0x9e   : > { %v617_v30 = vmax.f32 %v608_v24, %v609_v25  ;;  %v614_v31 = vmax.f32 %v606_v26, %v607_v29 }
  0x9f   : > { %428 = vmax.xlane.f32.xlu1 %v427_v32  ;;  %v537_v32 = vmin.f32 %v514_v16, %v515_v17  ;;  %v706_v17 = vmul.f32 %v698_v12, %v2015_v10 }
  0xa0   : > { %425 = vmax.xlane.f32.xlu0 %v424_v35  ;;  %v556_v35 = vld [vmem:[#allocation5 + $0x178] sm:$0xff] }
  0xa1   : > { %v715_v22 = vmax.f32 %v706_v17, %v707_v18 }
  0xa3   : > { %520 = vmax.xlane.f32.xlu1 %v519_v40  ;;  %v629_v40 = vmin.f32 %v608_v24, %v609_v25 }
  0xa4   : > { %517 = vmax.xlane.f32.xlu0 %v516_v41  ;;  %v626_v41 = vmin.f32 %v606_v26, %v607_v29  ;;  %v653_v26 = vld [vmem:[#allocation5 + $0x1f0] sm:$0xff]  ;;  %v652_v29 = vld [vmem:[#allocation5 + $0x1e8] sm:$0xff] }
  0xa7   : > { %440 = vmin.xlane.f32.xlu1 %v439_v44  ;;  %v563_v44 = vmul.f32 %v555_v34, %v2029_v36 }
  0xa8   : > { %437 = vmin.xlane.f32.xlu0 %v436_v45  ;;  %v564_v45 = vmul.f32 %v556_v35, %v2032_v37  ;;  %v660_v35 = vmul.f32 %v652_v29, %v2038_v43  ;;  %v750_v29 = vld [vmem:[#allocation5 + $0x268] sm:$0xff] }
  0xaa   : > { %v574_v55 = vmax.f32 %v563_v44, %v564_v45  ;;  %v586_v60 = vmin.f32 %v563_v44, %v564_v45  ;;  %v755_v44 = vmul.f32 %v747_v38, %v2015_v10  ;;  %v756_v45 = vmul.f32 %v748_v39, %v2018_v11  ;;  %v845_v38 = vld [vmem:[#allocation5 + $0x2d0] sm:$0xff]  ;;  %v846_v39 = vld [vmem:[#allocation5 + $0x2d8] sm:$0xff] }
  0xab   : > { %532 = vmin.xlane.f32.xlu1 %v531_v50  ;;  %v647_v50 = vld [vmem:[#allocation5 + $0x1c0] sm:$0xff] }
  0xac   : > { %529 = vmin.xlane.f32.xlu0 %v528_v51  ;;  %v648_v51 = vld [vmem:[#allocation5 + $0x1c8] sm:$0xff]  ;;  %v655_v54 = vmul.f32 %v647_v50, %v2005_v0  ;;  %v764_v50 = vmax.f32 %v755_v44, %v756_v45 }
  0xad   : > { %v656_v57 = vmul.f32 %v648_v51, %v2008_v1 }
  0xaf   : > { %477 = vmax.xlane.f32.xlu1 %v476_v63  ;;  %v663_v59 = vmax.f32 %v655_v54, %v656_v57  ;;  %v605_v63 = vld [vmem:[#allocation5 + $0x1b8] sm:$0xff] }
  0xb0   : > { %474 = vmax.xlane.f32.xlu0 %v473_v2  ;;  %v602_v2 = vld [vmem:[#allocation5 + $0x1a0] sm:$0xff] }
  0xb1   : > { %v610_v8 = vmul.f32 %v602_v2, %v2035_v42  ;;  %v796_v2 = vld [vmem:[#allocation5 + $0x290] sm:$0xff] }
  0xb3   : > { %569 = vmax.xlane.f32.xlu1 %v568_v4  ;;  %v678_v4 = vmin.f32 %v657_v52, %v658_v53  ;;  %v620_v19 = vmax.f32 %v610_v8, %v611_v9  ;;  %v632_v25 = vmin.f32 %v610_v8, %v611_v9 }
  0xb4   : > { %566 = vmax.xlane.f32.xlu0 %v565_v5  ;;  %v612_v5 = vmul.f32 %v604_v62, %v2029_v36 }
  0xb7   : > { %489 = vmin.xlane.f32.xlu1 %v488_v6  ;;  %v613_v6 = vmul.f32 %v605_v63, %v2032_v37 }
  0xb8   : > { %486 = vmin.xlane.f32.xlu0 %v485_v7  ;;  %v675_v7 = vmin.f32 %v655_v54, %v656_v57  ;;  %v702_v54 = vld [vmem:[#allocation5 + $0x230] sm:$0xff]  ;;  %v701_v57 = vld [vmem:[#allocation5 + $0x228] sm:$0xff] }
  0xb9   : > { %v623_v16 = vmax.f32 %v612_v5, %v613_v6  ;;  %v635_v24 = vmin.f32 %v612_v5, %v613_v6  ;;  %v709_v63 = vmul.f32 %v701_v57, %v2038_v43  ;;  %v795_v5 = vld [vmem:[#allocation5 + $0x288] sm:$0xff]  ;;  %v804_v6 = vmul.f32 %v796_v2, %v2015_v10  ;;  %v800_v2 = vld [vmem:[#allocation5 + $0x2b0] sm:$0xff] }
  0xba   : > { %v803_v13 = vmul.f32 %v795_v5, %v2008_v1  ;;  %v801_v5 = vld [vmem:[#allocation5 + $0x2b8] sm:$0xff] }
  0xbb   : > { %581 = vmin.xlane.f32.xlu1 %v580_v14  ;;  %v696_v14 = vld [vmem:[#allocation5 + $0x200] sm:$0xff] }
  0xbc   : > { %578 = vmin.xlane.f32.xlu0 %v577_v15  ;;  %v697_v15 = vld [vmem:[#allocation5 + $0x208] sm:$0xff]  ;;  %v704_v20 = vmul.f32 %v696_v14, %v2005_v0 }
  0xbd   : > { %v705_v21 = vmul.f32 %v697_v15, %v2008_v1 }
  0xbf   : > { %526 = vmax.xlane.f32.xlu1 %v525_v27  ;;  %v712_v23 = vmax.f32 %v704_v20, %v705_v21  ;;  %v654_v27 = vld [vmem:[#allocation5 + $0x1f8] sm:$0xff] }
  0xc0   : > { %523 = vmax.xlane.f32.xlu0 %v522_v28  ;;  %v651_v28 = vld [vmem:[#allocation5 + $0x1e0] sm:$0xff] }
  0xc1   : > { %v659_v34 = vmul.f32 %v651_v28, %v2035_v42  ;;  %v749_v28 = vld [vmem:[#allocation5 + $0x260] sm:$0xff] }
  0xc3   : > { %618 = vmax.xlane.f32.xlu1 %v617_v30  ;;  %v727_v30 = vmin.f32 %v706_v17, %v707_v18  ;;  %v669_v48 = vmax.f32 %v659_v34, %v660_v35  ;;  %v681_v53 = vmin.f32 %v659_v34, %v660_v35  ;;  %v757_v34 = vmul.f32 %v749_v28, %v2035_v42 }
  0xc4   : > { %615 = vmax.xlane.f32.xlu0 %v614_v31  ;;  %v724_v31 = vmin.f32 %v704_v20, %v705_v21  ;;  %v758_v35 = vmul.f32 %v750_v29, %v2038_v43 }
  0xc7   : > { %538 = vmin.xlane.f32.xlu1 %v537_v32  ;;  %v661_v32 = vmul.f32 %v653_v26, %v2029_v36 }
  0xc8   : > { %535 = vmin.xlane.f32.xlu0 %v534_v33  ;;  %v662_v33 = vmul.f32 %v654_v27, %v2032_v37 }
  0xca   : > { %v672_v47 = vmax.f32 %v661_v32, %v662_v33  ;;  %v684_v52 = vmin.f32 %v661_v32, %v662_v33 }
  0xcb   : > { %630 = vmin.xlane.f32.xlu1 %v629_v40  ;;  %v745_v40 = vld [vmem:[#allocation5 + $0x240] sm:$0xff] }
  0xcc   : > { %627 = vmin.xlane.f32.xlu0 %v626_v41  ;;  %v746_v41 = vld [vmem:[#allocation5 + $0x248] sm:$0xff]  ;;  %v753_v46 = vmul.f32 %v745_v40, %v2005_v0 }
  0xcd   : > { %v754_v49 = vmul.f32 %v746_v41, %v2008_v1 }
  0xcf   : > { %575 = vmax.xlane.f32.xlu1 %v574_v55  ;;  %v761_v51 = vmax.f32 %v753_v46, %v754_v49  ;;  %v703_v55 = vld [vmem:[#allocation5 + $0x238] sm:$0xff] }
  0xd0   : > { %572 = vmax.xlane.f32.xlu0 %v571_v56  ;;  %v700_v56 = vld [vmem:[#allocation5 + $0x220] sm:$0xff] }
  0xd1   : > { %v708_v62 = vmul.f32 %v700_v56, %v2035_v42 }
  0xd3   : > { %667 = vmax.xlane.f32.xlu1 %v666_v58  ;;  %v776_v58 = vmin.f32 %v755_v44, %v756_v45  ;;  %v718_v12 = vmax.f32 %v708_v62, %v709_v63  ;;  %v843_v44 = vld [vmem:[#allocation5 + $0x2c0] sm:$0xff]  ;;  %v844_v45 = vld [vmem:[#allocation5 + $0x2c8] sm:$0xff] }
  0xd4   : > { %664 = vmax.xlane.f32.xlu0 %v663_v59  ;;  %v773_v59 = vmin.f32 %v753_v46, %v754_v49  ;;  %v853_v49 = vmul.f32 %v845_v38, %v2015_v10 }
  0xd7   : > { %587 = vmin.xlane.f32.xlu1 %v586_v60  ;;  %v710_v60 = vmul.f32 %v702_v54, %v2029_v36 }
  0xd8   : > { %584 = vmin.xlane.f32.xlu0 %v583_v61  ;;  %v711_v61 = vmul.f32 %v703_v55, %v2032_v37 }
  0xda   : > { %v721_v9 = vmax.f32 %v710_v60, %v711_v61 }
  0xdb   : > { %679 = vmin.xlane.f32.xlu1 %v678_v4  ;;  %v794_v4 = vld [vmem:[#allocation5 + $0x280] sm:$0xff] }
  0xdc   : > { %676 = vmin.xlane.f32.xlu0 %v675_v7  ;;  %v805_v7 = vmul.f32 %v797_v3, %v2018_v11  ;;  %v802_v8 = vmul.f32 %v794_v4, %v2005_v0  ;;  %v779_v4 = vmin.f32 %v757_v34, %v758_v35 }
  0xde   : > { %v813_v17 = vmax.f32 %v804_v6, %v805_v7  ;;  %v810_v18 = vmax.f32 %v802_v8, %v803_v13  ;;  %v822_v33 = vmin.f32 %v802_v8, %v803_v13  ;;  %v809_v13 = vmul.f32 %v801_v5, %v2032_v37  ;;  %v942_v5 = vld [vmem:[#allocation5 + $0x348] sm:$0xff] }
  0xdf   : > { %624 = vmax.xlane.f32.xlu1 %v623_v16 }
  0xe0   : > { %621 = vmax.xlane.f32.xlu0 %v620_v19 }
  0xe3   : > { %716 = vmax.xlane.f32.xlu1 %v715_v22  ;;  %v733_v22 = vmin.f32 %v710_v60, %v711_v61 }
  0xe4   : > { %713 = vmax.xlane.f32.xlu0 %v712_v23  ;;  %v730_v23 = vmin.f32 %v708_v62, %v709_v63 }
  0xe7   : > { %636 = vmin.xlane.f32.xlu1 %v635_v24  ;;  %v751_v24 = vld [vmem:[#allocation5 + $0x270] sm:$0xff] }
  0xe8   : > { %633 = vmin.xlane.f32.xlu0 %v632_v25  ;;  %v752_v25 = vld [vmem:[#allocation5 + $0x278] sm:$0xff] }
  0xe9   : > { %v760_v32 = vmul.f32 %v752_v25, %v2032_v37 }
  0xeb   : > { %728 = vmin.xlane.f32.xlu1 %v727_v30  ;;  %v825_v30 = vmin.f32 %v804_v6, %v805_v7  ;;  %v798_v6 = vld [vmem:[#allocation5 + $0x2a0] sm:$0xff]  ;;  %v799_v7 = vld [vmem:[#allocation5 + $0x2a8] sm:$0xff] }
  0xec   : > { %725 = vmin.xlane.f32.xlu0 %v724_v31  ;;  %v759_v31 = vmul.f32 %v751_v24, %v2029_v36 }
  0xee   : > { %v782_v3 = vmin.f32 %v759_v31, %v760_v32 }
  0xef   : > { %673 = vmax.xlane.f32.xlu1 %v672_v47 }
  0xf0   : > { %670 = vmax.xlane.f32.xlu0 %v669_v48  ;;  %v770_v48 = vmax.f32 %v759_v31, %v760_v32 }
  0xf3   : > { %765 = vmax.xlane.f32.xlu1 %v764_v50  ;;  %v854_v50 = vmul.f32 %v846_v39, %v2018_v11 }
  0xf4   : > { %762 = vmax.xlane.f32.xlu0 %v761_v51  ;;  %v767_v51 = vmax.f32 %v757_v34, %v758_v35 }
  0xf7   : > { %685 = vmin.xlane.f32.xlu1 %v684_v52  ;;  %v851_v52 = vmul.f32 %v843_v44, %v2005_v0  ;;  %v849_v44 = vld [vmem:[#allocation5 + $0x2f0] sm:$0xff] }
  0xf8   : > { %682 = vmin.xlane.f32.xlu0 %v681_v53  ;;  %v852_v53 = vmul.f32 %v844_v45, %v2008_v1 }
  0xfb   : > { %777 = vmin.xlane.f32.xlu1 %v776_v58  ;;  %v862_v58 = vmax.f32 %v853_v49, %v854_v50 }
  0xfc   : > { %774 = vmin.xlane.f32.xlu0 %v773_v59  ;;  %v371_v14 = vpop.xlane.xlu1 %370  ;;  %v859_v59 = vmax.f32 %v851_v52, %v852_v53 }
  0xfd   : > { %v330_v15 = vpop.xlane.xlu0 %329 }
  0xfe   : > { %v393_v16 = vadd.f32 %v371_v14, %v330_v15  ;;  %v806_v14 = vmul.f32 %v798_v6, %v2035_v42  ;;  %v807_v15 = vmul.f32 %v799_v7, %v2038_v43 }
  0xff   : > { %722 = vmax.xlane.f32.xlu1 %v721_v9 }
 0x100   : > { %719 = vmax.xlane.f32.xlu0 %v718_v12  ;;  %v374_v19 = vpop.xlane.xlu1 %373  ;;  %v808_v12 = vmul.f32 %v800_v2, %v2029_v36 }
 0x101   : > { %v333_v20 = vpop.xlane.xlu0 %332 }
 0x102   : > { %v394_v21 = vadd.f32 %v374_v19, %v333_v20  ;;  %v831_v45 = vmin.f32 %v808_v12, %v809_v13 }
 0x103   : > { %814 = vmax.xlane.f32.xlu1 %v813_v17  ;;  %v871_v17 = vmin.f32 %v851_v52, %v852_v53 }
 0x104   : > { %811 = vmax.xlane.f32.xlu0 %v810_v18  ;;  %v345_v26 = vpop.xlane.xlu1 %344  ;;  %v894_v18 = vld [vmem:[#allocation5 + $0x310] sm:$0xff] }
 0x105   : > { %v342_v27 = vpop.xlane.xlu0 %341  ;;  %v902_v28 = vmul.f32 %v894_v18, %v2015_v10 }
 0x107   : > { %734 = vmin.xlane.f32.xlu1 %v733_v22  ;;  %v892_v22 = vld [vmem:[#allocation5 + $0x300] sm:$0xff] }
 0x108   : > { %731 = vmin.xlane.f32.xlu0 %v730_v23  ;;  %v386_v40 = vpop.xlane.xlu1 %385  ;;  %v893_v23 = vld [vmem:[#allocation5 + $0x308] sm:$0xff] }
 0x109   : > { %v383_v41 = vpop.xlane.xlu0 %382  ;;  %v398_v46 = vadd.f32 %v386_v40, %v345_v26  ;;  %v819_v26 = vmax.f32 %v808_v12, %v809_v13  ;;  %v901_v31 = vmul.f32 %v893_v23, %v2008_v1 }
 0x10a   : > { %v397_v47 = vadd.f32 %v383_v41, %v342_v27  ;;  %v816_v27 = vmax.f32 %v806_v14, %v807_v15 }
 0x10b   : > { %826 = vmin.xlane.f32.xlu1 %v825_v30  ;;  %v900_v30 = vmul.f32 %v892_v22, %v2005_v0 }
 0x10c   : > { %823 = vmin.xlane.f32.xlu0 %v822_v33  ;;  %v423_v54 = vpop.xlane.xlu1 %422 }
 0x10d   : > { %v420_v55 = vpop.xlane.xlu0 %419  ;;  %v443_v56 = vadd.f32 %v423_v54, %v394_v21  ;;  %v895_v21 = vld [vmem:[#allocation5 + $0x318] sm:$0xff]  ;;  %v908_v39 = vmax.f32 %v900_v30, %v901_v31  ;;  %v857_v54 = vmul.f32 %v849_v44, %v2029_v36  ;;  %v992_v44 = vld [vmem:[#allocation5 + $0x390] sm:$0xff] }
 0x10e   : > { %v442_v57 = vadd.f32 %v420_v55, %v393_v16  ;;  %v874_v16 = vmin.f32 %v853_v49, %v854_v50  ;;  %v903_v29 = vmul.f32 %v895_v21, %v2018_v11  ;;  %v848_v49 = vld [vmem:[#allocation5 + $0x2e8] sm:$0xff] }
 0x10f   : > { %771 = vmax.xlane.f32.xlu1 %v770_v48  ;;  %v847_v48 = vld [vmem:[#allocation5 + $0x2e0] sm:$0xff] }
 0x110   : > { %768 = vmax.xlane.f32.xlu0 %v767_v51  ;;  %v435_v60 = vpop.xlane.xlu1 %434  ;;  %v911_v38 = vmax.f32 %v902_v28, %v903_v29 }
 0x111   : > { %v432_v61 = vpop.xlane.xlu0 %431  ;;  %v2116_v62 = vadd.f32 %v435_v60, %v398_v46  ;;  %v828_v46 = vmin.f32 %v806_v14, %v807_v15  ;;  %v943_v60 = vld [vmem:[#allocation5 + $0x350] sm:$0xff]  ;;  %v950_v15 = vmul.f32 %v942_v5, %v2008_v1 }
 0x112   : > { %v2118_v63 = vadd.f32 %v432_v61, %v397_v47  ;;  %v850_v47 = vld [vmem:[#allocation5 + $0x2f8] sm:$0xff]  ;;  %v951_v12 = vmul.f32 %v943_v60, %v2015_v10 }
 0x113   : > { %863 = vmax.xlane.f32.xlu1 %v862_v58  ;;  %v858_v55 = vmul.f32 %v850_v47, %v2032_v37  ;;  %v923_v58 = vmin.f32 %v902_v28, %v903_v29  ;;  %v899_v29 = vld [vmem:[#allocation5 + $0x338] sm:$0xff] }
 0x114   : > { %860 = vmax.xlane.f32.xlu0 %v859_v59  ;;  %v339_v8 = vpop.xlane.xlu1 %338  ;;  %v920_v59 = vmin.f32 %v900_v30, %v901_v31  ;;  %v896_v30 = vld [vmem:[#allocation5 + $0x320] sm:$0xff]  ;;  %v897_v31 = vld [vmem:[#allocation5 + $0x328] sm:$0xff]  ;;  %v993_v47 = vld [vmem:[#allocation5 + $0x398] sm:$0xff] }
 0x115   : > { %v336_v9 = vpop.xlane.xlu0 %335 }
 0x117   : > { %783 = vmin.xlane.f32.xlu1 %v782_v3  ;;  %v944_v3 = vld [vmem:[#allocation5 + $0x358] sm:$0xff] }
 0x118   : > { %780 = vmin.xlane.f32.xlu0 %v779_v4  ;;  %v380_v19 = vpop.xlane.xlu1 %379  ;;  %v941_v4 = vld [vmem:[#allocation5 + $0x340] sm:$0xff]  ;;  %v952_v13 = vmul.f32 %v944_v3, %v2018_v11 }
 0x119   : > { %v377_v20 = vpop.xlane.xlu0 %376  ;;  %v396_v24 = vadd.f32 %v380_v19, %v339_v8  ;;  %v868_v8 = vmax.f32 %v857_v54, %v858_v55  ;;  %v949_v14 = vmul.f32 %v941_v4, %v2005_v0 }
 0x11a   : > { %v395_v25 = vadd.f32 %v377_v20, %v336_v9 }
 0x11b   : > { %875 = vmin.xlane.f32.xlu1 %v874_v16 }
 0x11c   : > { %872 = vmin.xlane.f32.xlu0 %v871_v17  ;;  %v472_v32 = vpop.xlane.xlu1 %471 }
 0x11d   : > { %v469_v33 = vpop.xlane.xlu0 %468  ;;  %v492_v34 = vadd.f32 %v472_v32, %v443_v56  ;;  %v855_v56 = vmul.f32 %v847_v48, %v2035_v42  ;;  %v990_v48 = vld [vmem:[#allocation5 + $0x380] sm:$0xff] }
 0x11e   : > { %v491_v35 = vadd.f32 %v469_v33, %v442_v57  ;;  %v856_v57 = vmul.f32 %v848_v49, %v2038_v43  ;;  %v991_v49 = vld [vmem:[#allocation5 + $0x388] sm:$0xff] }
 0x11f   : > { %820 = vmax.xlane.f32.xlu1 %v819_v26  ;;  %v898_v26 = vld [vmem:[#allocation5 + $0x330] sm:$0xff] }
 0x120   : > { %817 = vmax.xlane.f32.xlu0 %v816_v27  ;;  %v351_v40 = vpop.xlane.xlu1 %350  ;;  %v865_v9 = vmax.f32 %v855_v56, %v856_v57  ;;  %v880_v27 = vmin.f32 %v857_v54, %v858_v55  ;;  %v877_v28 = vmin.f32 %v855_v56, %v856_v57  ;;  %v1000_v54 = vmul.f32 %v992_v44, %v2015_v10 }
 0x121   : > { %v348_v41 = vpop.xlane.xlu0 %347  ;;  %v1001_v55 = vmul.f32 %v993_v47, %v2018_v11  ;;  %v998_v56 = vmul.f32 %v990_v48, %v2005_v0  ;;  %v999_v57 = vmul.f32 %v991_v49, %v2008_v1  ;;  %v948_v11 = vld [vmem:[#allocation5 + $0x378] sm:$0xff]  ;;  %v946_v1 = vld [vmem:[#allocation5 + $0x368] sm:$0xff] }
 0x123   : > { %912 = vmax.xlane.f32.xlu1 %v911_v38  ;;  %v906_v38 = vmul.f32 %v898_v26, %v2029_v36  ;;  %v1006_v3 = vmax.f32 %v998_v56, %v999_v57 }
 0x124   : > { %909 = vmax.xlane.f32.xlu0 %v908_v39  ;;  %v392_v50 = vpop.xlane.xlu1 %391  ;;  %v905_v39 = vmul.f32 %v897_v31, %v2038_v43 }
 0x125   : > { %v389_v51 = vpop.xlane.xlu0 %388  ;;  %v400_v52 = vadd.f32 %v392_v50, %v351_v40  ;;  %v972_v40 = vmin.f32 %v951_v12, %v952_v13 }
 0x126   : > { %v399_v53 = vadd.f32 %v389_v51, %v348_v41  ;;  %v969_v41 = vmin.f32 %v949_v14, %v950_v15 }
 0x127   : > { %832 = vmin.xlane.f32.xlu1 %v831_v45 }
 0x128   : > { %829 = vmin.xlane.f32.xlu0 %v828_v46  ;;  %v484_v61 = vpop.xlane.xlu1 %483 }
 0x129   : > { %v481_v2 = vpop.xlane.xlu0 %480  ;;  %v496_v6 = vadd.f32 %v484_v61, %v2116_v62  ;;  %v960_v62 = vmax.f32 %v951_v12, %v952_v13  ;;  %v1021_v12 = vmin.f32 %v1000_v54, %v1001_v55 }
 0x12a   : > { %v495_v7 = vadd.f32 %v481_v2, %v2118_v63  ;;  %v957_v63 = vmax.f32 %v949_v14, %v950_v15  ;;  %v1009_v2 = vmax.f32 %v1000_v54, %v1001_v55  ;;  %v956_v14 = vmul.f32 %v948_v11, %v2032_v37  ;;  %v283_v55 = vld [vmem:[#allocation7 + $0x18] sm:$0xff]  ;;  %v995_v11 = vld [vmem:[#allocation5 + $0x3a8] sm:$0xff] }
 0x12b   : > { %924 = vmin.xlane.f32.xlu1 %v923_v58  ;;  %v1018_v15 = vmin.f32 %v998_v56, %v999_v57  ;;  %v281_v56 = vld [vmem:[#allocation7 + $0x8] sm:$0xff] }
 0x12c   : > { %921 = vmin.xlane.f32.xlu0 %v920_v59  ;;  %v429_v16 = vpop.xlane.xlu1 %428 }
 0x12d   : > { %v426_v17 = vpop.xlane.xlu0 %425  ;;  %v445_v18 = vadd.f32 %v429_v16, %v396_v24 }
 0x12e   : > { %v444_v19 = vadd.f32 %v426_v17, %v395_v25  ;;  %v954_v17 = vmul.f32 %v946_v1, %v2038_v43 }
 0x12f   : > { %869 = vmax.xlane.f32.xlu1 %v868_v8 }
 0x130   : > { %866 = vmax.xlane.f32.xlu0 %v865_v9  ;;  %v521_v20 = vpop.xlane.xlu1 %520  ;;  %v945_v9 = vld [vmem:[#allocation5 + $0x360] sm:$0xff] }
 0x131   : > { %v518_v21 = vpop.xlane.xlu0 %517  ;;  %v2138_v22 = vadd.f32 %v521_v20, %v492_v34  ;;  %v907_v34 = vmul.f32 %v899_v29, %v2032_v37  ;;  %v953_v16 = vmul.f32 %v945_v9, %v2035_v42  ;;  %v1039_v20 = vld [vmem:[#allocation5 + $0x3c0] sm:$0xff]  ;;  %v2159_v37 = vld [vmem:[%s1994_s12 + $0x10] sm:$0xff]  ;;  %v2163_v29 = vld [vmem:[%s1994_s12 + $0x18] sm:$0xff] }
 0x132   : > { %v2140_v23 = vadd.f32 %v518_v21, %v491_v35  ;;  %v904_v35 = vmul.f32 %v896_v30, %v2035_v42  ;;  %v1040_v21 = vld [vmem:[#allocation5 + $0x3c8] sm:$0xff]  ;;  %v2167_v30 = vld [vmem:[%s1994_s12] sm:$0xff] }
 0x133   : > { %961 = vmax.xlane.f32.xlu1 %v960_v62  ;;  %v929_v10 = vmin.f32 %v906_v38, %v907_v34  ;;  %v963_v43 = vmax.f32 %v953_v16, %v954_v17  ;;  %v1047_v31 = vmul.f32 %v2167_v30, %v1039_v20  ;;  %v975_v54 = vmin.f32 %v953_v16, %v954_v17  ;;  %v2191_v16 = vld [vmem:[%s1994_s12 + $0x20] sm:$0xff] }
 0x134   : > { %958 = vmax.xlane.f32.xlu0 %v957_v63  ;;  %v441_v24 = vpop.xlane.xlu1 %440 }
 0x135   : > { %v438_v25 = vpop.xlane.xlu0 %437  ;;  %v2142_v32 = vadd.f32 %v441_v24, %v400_v52  ;;  %v917_v52 = vmax.f32 %v906_v38, %v907_v34  ;;  %v2171_v24 = vld [vmem:[%s1994_s12 + $0x8] sm:$0xff] }
 0x136   : > { %v2144_v33 = vadd.f32 %v438_v25, %v399_v53  ;;  %v914_v53 = vmax.f32 %v904_v35, %v905_v39  ;;  %v1048_v25 = vmul.f32 %v2171_v24, %v1040_v21 }
 0x137   : > { %881 = vmin.xlane.f32.xlu1 %v880_v27 }
 0x138   : > { %878 = vmin.xlane.f32.xlu0 %v877_v28  ;;  %v533_v45 = vpop.xlane.xlu1 %532 }
 0x139   : > { %v530_v46 = vpop.xlane.xlu0 %529  ;;  %v545_v50 = vadd.f32 %v533_v45, %v496_v6  ;;  %v926_v6 = vmin.f32 %v904_v35, %v905_v39  ;;  %v1055_v45 = vmax.f32 %v1047_v31, %v1048_v25 }
 0x13a   : > { %v544_v51 = vadd.f32 %v530_v46, %v495_v7  ;;  %v947_v7 = vld [vmem:[#allocation5 + $0x370] sm:$0xff] }
 0x13b   : > { %973 = vmin.xlane.f32.xlu1 %v972_v40  ;;  %v955_v13 = vmul.f32 %v947_v7, %v2029_v36  ;;  %v994_v7 = vld [vmem:[#allocation5 + $0x3a0] sm:$0xff] }
 0x13c   : > { %970 = vmin.xlane.f32.xlu0 %v969_v41  ;;  %v478_v58 = vpop.xlane.xlu1 %477  ;;  %v1002_v17 = vmul.f32 %v2191_v16, %v994_v7 }
 0x13d   : > { %v475_v59 = vpop.xlane.xlu0 %474  ;;  %v494_v60 = vadd.f32 %v478_v58, %v445_v18  ;;  %v1041_v18 = vld [vmem:[#allocation5 + $0x3d0] sm:$0xff]  ;;  %v966_v27 = vmax.f32 %v955_v13, %v956_v14 }
 0x13e   : > { %v493_v61 = vadd.f32 %v475_v59, %v444_v19  ;;  %v1042_v19 = vld [vmem:[#allocation5 + $0x3d8] sm:$0xff]  ;;  %v1049_v28 = vmul.f32 %v2159_v37, %v1041_v18  ;;  %v2195_v18 = vld [vmem:[%s1994_s12 + $0x28] sm:$0xff] }
 0x13f   : > { %918 = vmax.xlane.f32.xlu1 %v917_v52  ;;  %v1050_v42 = vmul.f32 %v2163_v29, %v1042_v19  ;;  %v1003_v19 = vmul.f32 %v2195_v18, %v995_v11 }
 0x140   : > { %915 = vmax.xlane.f32.xlu0 %v914_v53  ;;  %v570_v4 = vpop.xlane.xlu1 %569 }
 0x141   : > { %v567_v5 = vpop.xlane.xlu0 %566  ;;  %v1058_v40 = vmax.f32 %v1049_v28, %v1050_v42  ;;  %v590_v41 = vadd.f32 %v570_v4, %v2138_v22  ;;  %v280_v22 = vld [vmem:[#allocation7] sm:$0xff]  ;;  %v996_v4 = vld [vmem:[#allocation5 + $0x3b0] sm:$0xff] }
 0x142   : > { %v589_v44 = vadd.f32 %v567_v5, %v2140_v23 }
 0x143   : > { %1010 = vmax.xlane.f32.xlu1 %v1009_v2  ;;  %v288_v2 = vmul.f32 %v2167_v30, %v280_v22  ;;  %v284_v22 = vld [vmem:[#allocation7 + $0x20] sm:$0xff] }
 0x144   : > { %1007 = vmax.xlane.f32.xlu0 %v1006_v3  ;;  %v490_v8 = vpop.xlane.xlu1 %489  ;;  %v1067_v3 = vmin.f32 %v1047_v31, %v1048_v25  ;;  %v1043_v31 = vld [vmem:[#allocation5 + $0x3e0] sm:$0xff]  ;;  %v1044_v25 = vld [vmem:[#allocation5 + $0x3e8] sm:$0xff] }
 0x145   : > { %v487_v0 = vpop.xlane.xlu0 %486  ;;  %v498_v52 = vadd.f32 %v490_v8, %v2142_v32  ;;  %v289_v32 = vmul.f32 %v2171_v24, %v281_v56  ;;  %v285_v56 = vld [vmem:[#allocation7 + $0x28] sm:$0xff] }
 0x146   : > { %v497_v53 = vadd.f32 %v487_v0, %v2144_v33  ;;  %v1070_v33 = vmin.f32 %v1049_v28, %v1050_v42 }
 0x147   : > { %930 = vmin.xlane.f32.xlu1 %v929_v10  ;;  %v296_v1 = vadd.f32 %v289_v32, %v288_v2  ;;  %v293_v32 = vmul.f32 %v2195_v18, %v285_v56 }
 0x148   : > { %927 = vmin.xlane.f32.xlu0 %v926_v6  ;;  %v582_v62 = vpop.xlane.xlu1 %581  ;;  %v997_v6 = vld [vmem:[#allocation5 + $0x3b8] sm:$0xff] }
 0x149   : > { %v579_v63 = vpop.xlane.xlu0 %578  ;;  %v594_v36 = vadd.f32 %v582_v62, %v545_v50  ;;  %v978_v50 = vmin.f32 %v955_v13, %v956_v14  ;;  %v2187_v14 = vld [vmem:[%s1994_s12 + $0x38] sm:$0xff] }
 0x14a   : > { %v593_v26 = vadd.f32 %v579_v63, %v544_v51  ;;  %v282_v51 = vld [vmem:[#allocation7 + $0x10] sm:$0xff] }
 0x14b   : > { %1022 = vmin.xlane.f32.xlu1 %v1021_v12  ;;  %v2183_v12 = vld [vmem:[%s1994_s12 + $0x30] sm:$0xff] }
 0x14c   : > { %1019 = vmin.xlane.f32.xlu0 %v1018_v15  ;;  %v527_v38 = vpop.xlane.xlu1 %526  ;;  %v1004_v13 = vmul.f32 %v2183_v12, %v996_v4  ;;  %v1005_v15 = vmul.f32 %v2187_v14, %v997_v6 }
 0x14d   : > { %v524_v34 = vpop.xlane.xlu0 %523  ;;  %v543_v35 = vadd.f32 %v527_v38, %v494_v60  ;;  %v290_v60 = vmul.f32 %v2159_v37, %v282_v51 }
 0x14e   : > { %v542_v39 = vadd.f32 %v524_v34, %v493_v61  ;;  %v291_v61 = vmul.f32 %v2163_v29, %v283_v55  ;;  %v287_v55 = vld [vmem:[#allocation7 + $0x38] sm:$0xff] }
 0x14f   : > { %967 = vmax.xlane.f32.xlu1 %v966_v27  ;;  %v1045_v27 = vld [vmem:[#allocation5 + $0x3f0] sm:$0xff] }
 0x150   : > { %964 = vmax.xlane.f32.xlu0 %v963_v43  ;;  %v619_v46 = vpop.xlane.xlu1 %618  ;;  %v299_v9 = vadd.f32 %v291_v61, %v290_v60  ;;  %v1046_v43 = vld [vmem:[#allocation5 + $0x3f8] sm:$0xff] }
 0x151   : > { %v616_v47 = vpop.xlane.xlu0 %615  ;;  %v639_v48 = vadd.f32 %v619_v46, %v590_v41  ;;  %v1024_v41 = vmin.f32 %v1002_v17, %v1003_v19 }
 0x152   : > { %v638_v49 = vadd.f32 %v616_v47, %v589_v44  ;;  %v1053_v44 = vmul.f32 %v2183_v12, %v1045_v27 }
 0x153   : > { %1059 = vmax.xlane.f32.xlu1 %v1058_v40  ;;  %v1027_v40 = vmin.f32 %v1004_v13, %v1005_v15 }
 0x154   : > { %1056 = vmax.xlane.f32.xlu0 %v1055_v45  ;;  %v539_v23 = vpop.xlane.xlu1 %538  ;;  %v1052_v45 = vmul.f32 %v2195_v18, %v1044_v25 }
 0x155   : > { %v536_v57 = vpop.xlane.xlu0 %535  ;;  %v547_v58 = vadd.f32 %v539_v23, %v498_v52  ;;  %v286_v52 = vld [vmem:[#allocation7 + $0x30] sm:$0xff] }
 0x156   : > { %v546_v59 = vadd.f32 %v536_v57, %v497_v53  ;;  %v294_v2 = vmul.f32 %v2183_v12, %v286_v52 }
 0x157   : > { %979 = vmin.xlane.f32.xlu1 %v978_v50 }
 0x158   : > { %976 = vmin.xlane.f32.xlu0 %v975_v54  ;;  %v631_v5 = vpop.xlane.xlu1 %630 }
 0x159   : > { %v628_v10 = vpop.xlane.xlu0 %627  ;;  %v643_v8 = vadd.f32 %v631_v5, %v594_v36  ;;  %v1015_v36 = vmax.f32 %v1004_v13, %v1005_v15 }
 0x15a   : > { %v642_v0 = vadd.f32 %v628_v10, %v593_v26  ;;  %v1012_v26 = vmax.f32 %v1002_v17, %v1003_v19 }
 0x15b   : > { %1071 = vmin.xlane.f32.xlu1 %v1070_v33 }
 0x15c   : > { %1068 = vmin.xlane.f32.xlu0 %v1067_v3  ;;  %v576_v62 = vpop.xlane.xlu1 %575 }
 0x15d   : > { %v573_v63 = vpop.xlane.xlu0 %572  ;;  %v592_v20 = vadd.f32 %v576_v62, %v543_v35  ;;  %v1054_v35 = vmul.f32 %v2187_v14, %v1046_v43 }
 0x15e   : > { %v591_v21 = vadd.f32 %v573_v63, %v542_v39  ;;  %v1051_v39 = vmul.f32 %v2191_v16, %v1043_v31 }
 0x15f   : > { %300 = vadd.xlane.f32.xlu1 %v299_v9  ;;  %v1076_v60 = vmin.f32 %v1053_v44, %v1054_v35  ;;  %v1771_v9 = vmov 0.0|0.0  }
 0x160   : > { %297 = vadd.xlane.f32.xlu0 %v296_v1  ;;  %v668_v28 = vpop.xlane.xlu1 %667  ;;  %v1073_v61 = vmin.f32 %v1051_v39, %v1052_v45  ;;  %1504 = vmatprep.subr.bf16.mxu0 %v1771_v9 }
 0x161   : > { %v665_v42 = vpop.xlane.xlu0 %664  ;;  %v688_v38 = vadd.f32 %v668_v28, %v639_v48  ;;  %v1064_v48 = vmax.f32 %v1053_v44, %v1054_v35  ;;  %v1773_v35 = vmov 0.0  }
 0x162   : > { %v687_v34 = vadd.f32 %v665_v42, %v638_v49  ;;  %v1061_v49 = vmax.f32 %v1051_v39, %v1052_v45  ;;  %1493 = vmatprep.mubr.msk.f32.mxu0 %vm1772_vm0, %v1773_v35 }
 0x163   : > { %1016 = vmax.xlane.f32.xlu1 %v1015_v36 }
 0x164   : > { %1013 = vmax.xlane.f32.xlu0 %v1012_v26  ;;  %v588_v46 = vpop.xlane.xlu1 %587 }
 0x165   : > { %v585_v47 = vpop.xlane.xlu0 %584  ;;  %v596_v50 = vadd.f32 %v588_v46, %v547_v58  ;;  %v295_v58 = vmul.f32 %v2187_v14, %v287_v55 }
 0x166   : > { %v595_v51 = vadd.f32 %v585_v47, %v546_v59  ;;  %v292_v59 = vmul.f32 %v2191_v16, %v284_v22 }
 0x167   : > { %1028 = vmin.xlane.f32.xlu1 %v1027_v40  ;;  %v305_v10 = vadd.f32 %v295_v58, %v294_v2 }
 0x168   : > { %1025 = vmin.xlane.f32.xlu0 %v1024_v41  ;;  %v680_v53 = vpop.xlane.xlu1 %679  ;;  %v302_v6 = vadd.f32 %v293_v32, %v292_v59 }
 0x169   : > { %v677_v54 = vpop.xlane.xlu0 %676  ;;  %v692_v23 = vadd.f32 %v680_v53, %v643_v8 }
 0x16a   : > { %v691_v57 = vadd.f32 %v677_v54, %v642_v0 }
 0x16b   : > { %1065 = vmax.xlane.f32.xlu1 %v1064_v48 }
 0x16c   : > { %1062 = vmax.xlane.f32.xlu0 %v1061_v49  ;;  %v625_v33 = vpop.xlane.xlu1 %624 }
 0x16d   : > { %v622_v3 = vpop.xlane.xlu0 %621  ;;  %v641_v4 = vadd.f32 %v625_v33, %v592_v20 }
 0x16e   : > { %v640_v5 = vadd.f32 %v622_v3, %v591_v21 }
 0x16f   : > { %1077 = vmin.xlane.f32.xlu1 %v1076_v60 }
 0x170   : > { %1074 = vmin.xlane.f32.xlu0 %v1073_v61  ;;  %v717_v7 = vpop.xlane.xlu1 %716 }
 0x171   : > { %v714_v11 = vpop.xlane.xlu0 %713  ;;  %v737_v8 = vadd.f32 %v717_v7, %v688_v38 }
 0x172   : > { %v736_v0 = vadd.f32 %v714_v11, %v687_v34 }
 0x173   : > { %306 = vadd.xlane.f32.xlu1 %v305_v10 }
 0x174   : > { %303 = vadd.xlane.f32.xlu0 %v302_v6  ;;  %v637_v1 = vpop.xlane.xlu1 %636 }
 0x175   : > { %v634_v13 = vpop.xlane.xlu0 %633  ;;  %v645_v15 = vadd.f32 %v637_v1, %v596_v50 }
 0x176   : > { %v644_v17 = vadd.f32 %v634_v13, %v595_v51 }
 0x178   : > { %v729_v19 = vpop.xlane.xlu1 %728 }
 0x179   : > { %v726_v62 = vpop.xlane.xlu0 %725  ;;  %v741_v63 = vadd.f32 %v729_v19, %v692_v23 }
 0x17a   : > { %v740_v20 = vadd.f32 %v726_v62, %v691_v57 }
 0x17c   : > { %v674_v21 = vpop.xlane.xlu1 %673 }
 0x17d   : > { %v671_v36 = vpop.xlane.xlu0 %670  ;;  %v690_v26 = vadd.f32 %v674_v21, %v641_v4 }
 0x17e   : > { %v689_v27 = vadd.f32 %v671_v36, %v640_v5 }
 0x180   : > { %v766_v28 = vpop.xlane.xlu1 %765 }
 0x181   : > { %v763_v42 = vpop.xlane.xlu0 %762  ;;  %v786_v43 = vadd.f32 %v766_v28, %v737_v8 }
 0x182   : > { %v785_v31 = vadd.f32 %v763_v42, %v736_v0 }
 0x184   : > { %v686_v25 = vpop.xlane.xlu1 %685 }
 0x185   : > { %v683_v38 = vpop.xlane.xlu0 %682  ;;  %v694_v34 = vadd.f32 %v686_v25, %v645_v15 }
 0x186   : > { %v693_v40 = vadd.f32 %v683_v38, %v644_v17 }
 0x188   : > { %v778_v41 = vpop.xlane.xlu1 %777 }
 0x189   : > { %v775_v44 = vpop.xlane.xlu0 %774  ;;  %v790_v39 = vadd.f32 %v778_v41, %v741_v63 }
 0x18a   : > { %v789_v45 = vadd.f32 %v775_v44, %v740_v20 }
 0x18c   : > { %v723_v46 = vpop.xlane.xlu1 %722 }
 0x18d   : > { %v720_v47 = vpop.xlane.xlu0 %719  ;;  %v739_v50 = vadd.f32 %v723_v46, %v690_v26 }
 0x18e   : > { %v738_v51 = vadd.f32 %v720_v47, %v689_v27 }
 0x190   : > { %v815_v48 = vpop.xlane.xlu1 %814 }
 0x191   : > { %v812_v49 = vpop.xlane.xlu0 %811  ;;  %v835_v52 = vadd.f32 %v815_v48, %v786_v43 }
 0x192   : > { %v834_v53 = vadd.f32 %v812_v49, %v785_v31 }
 0x194   : > { %v735_v54 = vpop.xlane.xlu1 %734 }
 0x195   : > { %v732_v55 = vpop.xlane.xlu0 %731  ;;  %v743_v22 = vadd.f32 %v735_v54, %v694_v34 }
 0x196   : > { %v742_v56 = vadd.f32 %v732_v55, %v693_v40 }
 0x198   : > { %v827_v23 = vpop.xlane.xlu1 %826 }
 0x199   : > { %v824_v57 = vpop.xlane.xlu0 %823  ;;  %v839_v60 = vadd.f32 %v827_v23, %v790_v39 }
 0x19a   : > { %v838_v61 = vadd.f32 %v824_v57, %v789_v45 }
 0x19c   : > { %v772_v2 = vpop.xlane.xlu1 %771 }
 0x19d   : > { %v769_v58 = vpop.xlane.xlu0 %768  ;;  %v788_v59 = vadd.f32 %v772_v2, %v739_v50 }
 0x19e   : > { %v787_v32 = vadd.f32 %v769_v58, %v738_v51 }
 0x1a0   : > { %v864_v33 = vpop.xlane.xlu1 %863 }
 0x1a1   : > { %v861_v3 = vpop.xlane.xlu0 %860  ;;  %v884_v4 = vadd.f32 %v864_v33, %v835_v52 }
 0x1a2   : > { %v883_v5 = vadd.f32 %v861_v3, %v834_v53 }
 0x1a4   : > { %v784_v10 = vpop.xlane.xlu1 %783 }
 0x1a5   : > { %v781_v6 = vpop.xlane.xlu0 %780  ;;  %v792_v7 = vadd.f32 %v784_v10, %v743_v22 }
 0x1a6   : > { %v791_v11 = vadd.f32 %v781_v6, %v742_v56 }
 0x1a8   : > { %v876_v8 = vpop.xlane.xlu1 %875 }
 0x1a9   : > { %v873_v0 = vpop.xlane.xlu0 %872  ;;  %v888_v53 = vadd.f32 %v876_v8, %v839_v60 }
 0x1aa   : > { %v887_v54 = vadd.f32 %v873_v0, %v838_v61 }
 0x1ac   : > { %v821_v1 = vpop.xlane.xlu1 %820 }
 0x1ad   : > { %v818_v13 = vpop.xlane.xlu0 %817  ;;  %v2207_v15 = vadd.f32 %v821_v1, %v788_v59 }
 0x1ae   : > { %v2209_v17 = vadd.f32 %v818_v13, %v787_v32 }
 0x1b0   : > { %v913_v19 = vpop.xlane.xlu1 %912 }
 0x1b1   : > { %v910_v62 = vpop.xlane.xlu0 %909  ;;  %v933_v55 = vadd.f32 %v913_v19, %v884_v4 }
 0x1b2   : > { %v932_v22 = vadd.f32 %v910_v62, %v883_v5 }
 0x1b4   : > { %v833_v63 = vpop.xlane.xlu1 %832 }
 0x1b5   : > { %v830_v20 = vpop.xlane.xlu0 %829  ;;  %v2211_v21 = vadd.f32 %v833_v63, %v792_v7 }
 0x1b6   : > { %v2213_v36 = vadd.f32 %v830_v20, %v791_v11 }
 0x1b8   : > { %v925_v26 = vpop.xlane.xlu1 %924 }
 0x1b9   : > { %v922_v27 = vpop.xlane.xlu0 %921  ;;  %v937_v56 = vadd.f32 %v925_v26, %v888_v53 }
 0x1ba   : > { %v936_v23 = vadd.f32 %v922_v27, %v887_v54 }
 0x1bc   : > { %v2215_v28 = vpop.xlane.xlu1 %869 }
 0x1bd   : > { %v2217_v42 = vpop.xlane.xlu0 %866 }
 0x1c0   : > { %v962_v43 = vpop.xlane.xlu1 %961 }
 0x1c1   : > { %v959_v31 = vpop.xlane.xlu0 %958  ;;  %v982_v58 = vadd.f32 %v962_v43, %v933_v55 }
 0x1c2   : > { %v981_v59 = vadd.f32 %v959_v31, %v932_v22 }
 0x1c4   : > { %v882_v25 = vpop.xlane.xlu1 %881 }
 0x1c5   : > { %v879_v38 = vpop.xlane.xlu0 %878  ;;  %v890_v53 = vadd.f32 %v882_v25, %v2211_v21 }
 0x1c6   : > { %v889_v54 = vadd.f32 %v879_v38, %v2213_v36 }
 0x1c8   : > { %v974_v34 = vpop.xlane.xlu1 %973 }
 0x1c9   : > { %v971_v40 = vpop.xlane.xlu0 %970  ;;  %v986_v32 = vadd.f32 %v974_v34, %v937_v56 }
 0x1ca   : > { %v985_v33 = vadd.f32 %v971_v40, %v936_v23 }
 0x1cc   : > { %v919_v41 = vpop.xlane.xlu1 %918 }
 0x1cd   : > { %v916_v44 = vpop.xlane.xlu0 %915 }
 0x1d0   : > { %v1011_v35 = vpop.xlane.xlu1 %1010 }
 0x1d1   : > { %v1008_v39 = vpop.xlane.xlu0 %1007  ;;  %v1031_v3 = vadd.f32 %v1011_v35, %v982_v58 }
 0x1d2   : > { %v1030_v10 = vadd.f32 %v1008_v39, %v981_v59 }
 0x1d4   : > { %v931_v45 = vpop.xlane.xlu1 %930 }
 0x1d5   : > { %v928_v46 = vpop.xlane.xlu0 %927  ;;  %v939_v56 = vadd.f32 %v931_v45, %v890_v53 }
 0x1d6   : > { %v938_v23 = vadd.f32 %v928_v46, %v889_v54 }
 0x1d8   : > { %v1023_v47 = vpop.xlane.xlu1 %1022 }
 0x1d9   : > { %v1020_v50 = vpop.xlane.xlu0 %1019  ;;  %v1035_v6 = vadd.f32 %v1023_v47, %v986_v32 }
 0x1da   : > { %v1034_v7 = vadd.f32 %v1020_v50, %v985_v33 }
 0x1dc   : > { %v968_v51 = vpop.xlane.xlu1 %967 }
 0x1dd   : > { %v965_v48 = vpop.xlane.xlu0 %964 }
 0x1e0   : > { %v1060_v49 = vpop.xlane.xlu1 %1059 }
 0x1e1   : > { %v1057_v52 = vpop.xlane.xlu0 %1056  ;;  %v1080_v13 = vadd.f32 %v1060_v49, %v1031_v3  ;;  %v886_v49 = vadd.f32 %v2215_v28, %v2207_v15 }
 0x1e2   : > { %v1079_v63 = vadd.f32 %v1057_v52, %v1030_v10  ;;  %v885_v52 = vadd.f32 %v2217_v42, %v2209_v17 }
 0x1e3   : > { %v1088_v8 = vmul.f32 0.0625, %v1080_v13  ;;  %v935_v55 = vadd.f32 %v919_v41, %v886_v49 }
 0x1e4   : > { %v980_v57 = vpop.xlane.xlu1 %979  ;;  %v1087_v0 = vmul.f32 0.0625, %v1079_v63  ;;  %v934_v22 = vadd.f32 %v916_v44, %v885_v52 }
 0x1e5   : > { %v977_v2 = vpop.xlane.xlu0 %976  ;;  %v984_v32 = vadd.f32 %v968_v51, %v935_v55  ;;  %v988_v3 = vadd.f32 %v980_v57, %v939_v56 }
 0x1e6   : > { %v983_v33 = vadd.f32 %v965_v48, %v934_v22 }
 0x1e8   : > { %v1072_v11 = vpop.xlane.xlu1 %1071 }
 0x1e9   : > { %v1069_v1 = vpop.xlane.xlu0 %1068  ;;  %v1084_v60 = vadd.f32 %v1072_v11, %v1035_v6 }
 0x1ea   : > { %v1083_v61 = vadd.f32 %v1069_v1, %v1034_v7 }
 0x1eb   : > { %v1092_v20 = vmul.f32 0.0625, %v1084_v60  ;;  %v1105_v60 = vld [vmem:[%s2316_s3] sm:$0x3] }
 0x1ec   : > { %v301_v4 = vpop.xlane.xlu1 %300  ;;  %v1091_v26 = vmul.f32 0.0625, %v1083_v61  ;;  %v1181_v61 = vld [vmem:[%s2317_s4] sm:$0xff] }
 0x1ed   : > { %v298_v5 = vpop.xlane.xlu0 %297  ;;  %v309_v19 = vmul.f32 0.00024414063, %v301_v4  ;;  %1498 = vmatprep.mubr.msk.f32.mxu1 %vm1100_vm2, %v1181_v61 }
 0x1ee   : > { %v308_v62 = vmul.f32 0.00024414063, %v298_v5 }
 0x1ef   : > { %v1097_v43 = vsel %vm1095_vm1, %v309_v19, %v1088_v8  ;;  %v1183_v19 = vld [vmem:[%s2317_s4 + $0x10] sm:$0xff] }
 0x1f0   : > { %v1096_v27 = vsel %vm1095_vm1, %v308_v62, %v1087_v0  ;;  %v1017_v31 = vpop.xlane.xlu1 %1016  ;;  %v1102_v35 = vsel %vm1100_vm2, %v1097_v43, %v1092_v20  ;;  %v1182_v0 = vld [vmem:[%s2317_s4 + $0x8] sm:$0xff]  ;;  %v1184_v62 = vld [vmem:[%s2317_s4 + $0x18] sm:$0xff] }
 0x1f1   : > { %v1014_v34 = vpop.xlane.xlu0 %1013  ;;  %v1101_v40 = vsel %vm1100_vm2, %v1096_v27, %v1091_v26  ;;  %v1033_v10 = vadd.f32 %v1017_v31, %v984_v32 }
 0x1f2   : > { %v1505_v39 = vpack.c.bf16 %v1102_v35, %v1101_v40  ;;  %v1032_v6 = vadd.f32 %v1014_v34, %v983_v33 }
 0x1f4   : > { %1506 = vmatpush3.bf16.msra.mxu0 %v1505_v39  ;;  %v1029_v47 = vpop.xlane.xlu1 %1028 }
 0x1f5   : > { %v1026_v50 = vpop.xlane.xlu0 %1025  ;;  %1507 = vmatprep.subr.bf16.mxu0 %v1771_v9  ;;  %v987_v9 = vadd.f32 %v977_v2, %v938_v23  ;;  %v1037_v15 = vadd.f32 %v1029_v47, %v988_v3 }
 0x1f7   : > { %v1036_v28 = vadd.f32 %v1026_v50, %v987_v9 }
 0x1f8   : > { %v1066_v58 = vpop.xlane.xlu1 %1065 }
 0x1f9   : > { %v1063_v59 = vpop.xlane.xlu0 %1062  ;;  %v1082_v42 = vadd.f32 %v1066_v58, %v1033_v10 }
 0x1fa   : > { %v1081_v21 = vadd.f32 %v1063_v59, %v1032_v6 }
 0x1fb   : > { %v1090_v44 = vmul.f32 0.0625, %v1082_v42 }
 0x1fc   : > { %v1078_v7 = vpop.xlane.xlu1 %1077  ;;  %v1089_v45 = vmul.f32 0.0625, %v1081_v21 }
 0x1fd   : > { %v1075_v17 = vpop.xlane.xlu0 %1074  ;;  %v1086_v25 = vadd.f32 %v1078_v7, %v1037_v15 }
 0x1fe   : > { %v1085_v36 = vadd.f32 %v1075_v17, %v1036_v28 }
 0x1ff   : > { %v1094_v51 = vmul.f32 0.0625, %v1086_v25 }
 0x200   : > { %v307_v38 = vpop.xlane.xlu1 %306  ;;  %v1093_v48 = vmul.f32 0.0625, %v1085_v36 }
 0x201   : > { %v304_v41 = vpop.xlane.xlu0 %303  ;;  %v311_v46 = vmul.f32 0.00024414063, %v307_v38 }
 0x202   : > { %v310_v11 = vmul.f32 0.00024414063, %v304_v41 }
 0x203   : > { %v1099_v57 = vsel %vm1095_vm1, %v311_v46, %v1090_v44 }
 0x204   : > { %v1098_v2 = vsel %vm1095_vm1, %v310_v11, %v1089_v45  ;;  %v1104_v13 = vsel %vm1100_vm2, %v1099_v57, %v1094_v51 }
 0x205   : > { %v1103_v1 = vsel %vm1100_vm2, %v1098_v2, %v1093_v48 }
 0x206   : > { %v1508_v63 = vpack.c.bf16 %v1104_v13, %v1103_v1 }
 0x208   : > { %1509 = vmatpush3.bf16.msra.mxu0 %v1508_v63 }
 0x20b   : > { %1494 = vmatmul.mubr.msk.f32.vlgmr.msra.gmra.mrb[0].mxu0 %vm1106_vm3, %v1105_v60 }
 0x2de   : > { %v1176_v4 = vpop.f32.mrb[0].mxu0 }
 0x2df   : > { %v1180_v5 = vmax.f32 %v1176_v4, 0.0  ;;  %v1495_v8 = vpop.f32.mrb[1].mxu0 }
 0x2e1   : > { %1496 = vmatprep.subr.msk.mxu1 %vm1197_vm4, %v1180_v5 }
 0x2e2   : > { %1497 = vmatpush3.msk.msra.mxu1 %vm1197_vm4, %v1180_v5 }
 0x2e3   : > { %1499 = vmatmul.mubr.msk.f32.vlgmr.msra.gmra.mrb[0].mxu1 %vm1100_vm2, %v1182_v0 }
 0x2e4   : > { %1501 = vmatprep.mubr.msk.f32.mxu1 %vm1100_vm2, %v1183_v19 }
 0x2e7   : > { %1502 = vmatmul.mubr.msk.f32.gmra.mrb[2].mxu1 %vm1100_vm2, %v1184_v62 }
 0x3b6   : > { %v1500_v20 = vpop.f32.mrb[0].mxu1 }
 0x3b7   : > { %v1290_v26 = vsel %vm1286_vm5, %v1500_v20, 0.0  ;;  %v1267_v27 = vpop.f32.mrb[1].mxu1 }
 0x3b8   : > { %v1287_v43 = vsel %vm1286_vm5, %v1267_v27, 0.0  ;;  %1291 = vadd.xlane.f32.xlu1 %v1290_v26 }
 0x3b9   : > { %1288 = vadd.xlane.f32.xlu0 %v1287_v43 }
 0x3ba   : > { %v1503_v31 = vpop.f32.mrb[2].mxu1 }
 0x3bb   : > { %v1296_v34 = vsel %vm1286_vm5, %v1503_v31, 0.0  ;;  %v1277_v40 = vpop.f32.mrb[3].mxu1 }
 0x3bc   : > { %v1293_v35 = vsel %vm1286_vm5, %v1277_v40, 0.0  ;;  %1297 = vadd.xlane.f32.xlu1 %v1296_v34 }
 0x3bd   : > { %1294 = vadd.xlane.f32.xlu0 %v1293_v35 }
 0x445   : > { %v1292_v39 = vpop.xlane.xlu1 %1291 }
 0x446   : > { %v1465_v47 = vmul.f32 -1.442695, %v1292_v39  ;;  %v1289_v50 = vpop.xlane.xlu0 %1288 }
 0x447   : > { %v1464_v49 = vmul.f32 -1.442695, %v1289_v50 }
 0x448   : > { %1584 = vpow2.f32 %v1465_v47 }
 0x449   : > { %1586 = vpow2.f32 %v1464_v49  ;;  %v1298_v52 = vpop.xlane.xlu1 %1297 }
 0x44a   : > { %v1467_v53 = vmul.f32 -1.442695, %v1298_v52  ;;  %v1295_v54 = vpop.xlane.xlu0 %1294 }
 0x44b   : > { %v1466_v55 = vmul.f32 -1.442695, %v1295_v54 }
 0x44c   : > { %1588 = vpow2.f32 %v1467_v53 }
 0x44d   : > { %1590 = vpow2.f32 %v1466_v55 }
 0x452   : > { %v1585_v22 = vpop.eup %1584 }
 0x453   : > { %v1587_v56 = vpop.eup %1586  ;;  %v1312_v23 = vadd.f32 1.0, %v1585_v22 }
 0x454   : > { %v1311_v58 = vadd.f32 1.0, %v1587_v56 }
 0x455   : > { %1592 = vrcp.f32 %v1312_v23 }
 0x456   : > { %v1589_v59 = vpop.eup %1588  ;;  %1594 = vrcp.f32 %v1311_v58 }
 0x457   : > { %v1591_v32 = vpop.eup %1590  ;;  %v1314_v33 = vadd.f32 1.0, %v1589_v59 }
 0x458   : > { %v1313_v3 = vadd.f32 1.0, %v1591_v32 }
 0x459   : > { %1596 = vrcp.f32 %v1314_v33 }
 0x45a   : > { %1598 = vrcp.f32 %v1313_v3 }
 0x45f   : > { %v1593_v9 = vpop.eup %1592 }
 0x460   : > { %v1595_v10 = vpop.eup %1594  ;;  %v1325_v6 = vmul.f32 %v2159_v37, %v1593_v9  ;;  %v1326_v15 = vmul.f32 %v2163_v29, %v1593_v9 }
 0x461   : > { %v1323_v28 = vmul.f32 %v2167_v30, %v1595_v10  ;;  %v1324_v7 = vmul.f32 %v2171_v24, %v1595_v10 }
 0x462   : > { %1333 = vst [vmem:[%s271_s7 + $0x10] sm:$0xff] %v1325_v6  ;;  %1334 = vst [vmem:[%s271_s7 + $0x18] sm:$0xff] %v1326_v15 }
 0x463   : > { %v1597_v17 = vpop.eup %1596  ;;  %1331 = vst [vmem:[%s271_s7] sm:$0xff] %v1323_v28  ;;  %1332 = vst [vmem:[%s271_s7 + $0x8] sm:$0xff] %v1324_v7 }
 0x464   : > { %v1599_v42 = vpop.eup %1598  ;;  %v1329_v37 = vmul.f32 %v2183_v12, %v1597_v17  ;;  %v1330_v29 = vmul.f32 %v2187_v14, %v1597_v17 }
 0x465   : > { %v1327_v30 = vmul.f32 %v2191_v16, %v1599_v42  ;;  %v1328_v24 = vmul.f32 %v2195_v18, %v1599_v42 }
 0x466   : > { %1337 = vst [vmem:[%s271_s7 + $0x30] sm:$0xff] %v1329_v37  ;;  %1338 = vst [vmem:[%s271_s7 + $0x38] sm:$0xff] %v1330_v29 }
 0x467   : > { %1335 = vst [vmem:[%s271_s7 + $0x20] sm:$0xff] %v1327_v30  ;;  %1336 = vst [vmem:[%s271_s7 + $0x28] sm:$0xff] %v1328_v24 }
 0x468   : > { %1707 = shalt.err (!%p1704_p1)
}
 0x469   : > { %s1708_s28 = scalar_lea.hbm %s2265_s26, 1024  ;;  %s1712_s30 = scalar_lea.hbm %s2318_s5, 2048 }
 0x46a   : > { %p1709_p13 = scmp.ne.s32.totalorder %s2265_s26, %s1708_s28  ;;  %p1713_p4 = scmp.lt.u32.totalorder %s2265_s26, %s2318_s5 }
 0x46b   : > { %p1714_p5 = scmp.lt.u32.totalorder %s1712_s30, %s1708_s28  ;;  %p1716_p11 = scmp.lt.u32.totalorder %s1708_s28, %s2265_s26 }
 0x46c   : > { %p1710_p6 = pnand %p1709_p13, %p2332_p0 }
 0x46d   : > { %p1715_p8 = por %p1714_p5, %p1713_p4 }
 0x46e   : > { %p1711_p10 = pneg %p1710_p6 }
 0x46f   : > { %p1717_p2 = por %p1716_p11, %p1715_p8 }
 0x471   : > { %p1718_p3 = pnand %p1717_p2, %p1711_p10 }
 0x473   : > { %1721 = shalt.err (!%p1718_p3)
}
 0x474   : > { %s1775_s7 = smov 256   ;;  %s1776_s12 = smov 16  }
 0x475   : > { %1520 = dma.vmem_to_hbm [thread:$0]  (%p2332_p0), %s2267_s8, 1024, %s2265_s26, %s1340_s22, %s1775_s7, %s1775_s7, %s1776_s12  }
 0x476 PF: > { %s1368_s24 = sand.u32 1, %s1752_s18   ;;  %p2333_p7 = scmp.ne.s32.totalorder %s2323_s25, 0 }
 0x477   : > { %p2334_p9 = scmp.ge.s32.totalorder %s1764_s21, 2  ;;  %s1369_s6 = scalar_lea.sflag [#allocation4], %s1368_s24 }
 0x479   : > { %p1534_p12 = pnand %p2334_p9, %p2333_p7 }
 0x47b   : > { %1747 = dma.done.wait (!%p1534_p12), %s1369_s6, 1024  }
 0x47c   : > { %1749 = vsyncadd (!%p1534_p12), %s1369_s6, 4294966272  ;;  %p19_p1 = scmp.ge.s32.totalorder %s1923_s29, 4   ;;  %s2335_s18 = smov %s1756_s19 }
 0x47d   : > { %s2336_s19 = smov %s1760_s20  ;;  %s2337_s20 = smov %s1939_s27 }
 0x47e   : > { %s2338_s21 = smov %s1923_s29  ;;  %21 = sbr.rel (!%p19_p1) target bundleno = 6 (0x6), region = 108 }
 0x485   :  { %1374 = vsyncpa [#allocation3], 1 }
 0x486   :  { %1376 = vsyncpa [#allocation3 + $0x1], 1 }
 0x487   :  { %1377 = vsyncpa [#allocation6], 1 }
 0x488   :  { %1378 = vsyncpa [#allocation4], 1 }
 0x489   :  { %1380 = vsyncpa [#allocation4 + $0x1], 1 }

</bundles_post_ra>
